<compile_context>
chip_gen: v6e
topology: v6e:2x2x1
jax: 0.10.0
libtpu: 0.0.40
codegen_flags: <defaults>
</compile_context>

<pallas_src>
import math
import functools

import numpy as np
import jax
import jax.numpy as jnp
from jax import lax
from jax.experimental import pallas as pl
from jax.experimental.pallas import tpu as pltpu


# ---------------------------------------------------------------------------
# 1x1 conv == position-wise linear:  y = x @ W + b   (tiled over M = B*L)
# ---------------------------------------------------------------------------
def _linear_kernel(x_ref, w_ref, b_ref, o_ref):
    # x: (TM, Cin)  w: (Cin, Cout)  b: (1, Cout)  o: (TM, Cout)
    o_ref[...] = (
        jnp.dot(x_ref[...], w_ref[...], preferred_element_type=jnp.float32)
        + b_ref[...]
    ).astype(o_ref.dtype)


def linear_1x1(x, w, b, *, tile_m=512):
    """x: (M, Cin), w: (Cin, Cout), b: (Cout,) -> (M, Cout) float32."""
    M, Cin = x.shape
    Cout = w.shape[1]
    tm = M if M <= tile_m else tile_m          # full block for small M, else pipelined tiles
    grid = (pl.cdiv(M, tm),)
    return pl.pallas_call(
        _linear_kernel,
        out_shape=jax.ShapeDtypeStruct((M, Cout), jnp.float32),
        grid=grid,
        in_specs=[
            pl.BlockSpec((tm, Cin), lambda i: (i, 0)),
            pl.BlockSpec((Cin, Cout), lambda i: (0, 0)),   # weights stay VMEM-resident
            pl.BlockSpec((1, Cout), lambda i: (0, 0)),
        ],
        out_specs=pl.BlockSpec((tm, Cout), lambda i: (i, 0)),
        compiler_params=pltpu.CompilerParams(dimension_semantics=("parallel",)),
    )(x, w, b.reshape(1, Cout))


# ---------------------------------------------------------------------------
# in-kernel circular lane rolls (static shift), explicit concat => unambiguous
# ---------------------------------------------------------------------------
def _roll_left(x, m, width):
    m = m % width
    if m == 0:
        return x
    return jnp.concatenate([x[:, m:], x[:, :m]], axis=-1)


def _roll_right(x, m, width):
    m = m % width
    if m == 0:
        return x
    return jnp.concatenate([x[:, width - m:], x[:, :width - m]], axis=-1)


def _skew_rel_to_abs(s_rel_p, bit_masks, length):
    """s_rel_p: (TQ, 2L). Returns (TQ, L) with out[a, j] = s_rel_p[a, j - i + L - 1],
    i = row0 + a (the reference _relative_to_absolute).  bit_masks[bit] is True
    where the per-row left-roll amount has that bit set."""
    W = 2 * length
    x = s_rel_p
    for bit, msk in enumerate(bit_masks):
        x = jnp.where(msk, _roll_left(x, 1 << bit, W), x)
    return x[:, :length]


def _skew_abs_to_rel(prob, bit_masks, length):
    """prob: (TQ, L). Returns (TQ, 2L): cols [0, 2L-1) hold
    rel_w[a, r] = prob[a, i + r - (L-1)] (0 outside range), i = row0 + a;
    col 2L-1 is always 0 (the reference _absolute_to_relative, padded)."""
    W = 2 * length
    x = jnp.concatenate([prob, jnp.zeros_like(prob)], axis=-1)   # (TQ, 2L), right half 0
    for bit, msk in enumerate(bit_masks):
        x = jnp.where(msk, _roll_right(x, 1 << bit, W), x)
    return x


# ---------------------------------------------------------------------------
# relative multi-head attention + output projection, fused: one (batch, q-tile)
# per grid step, all heads processed inside the step, merged-head lane-dense
# result immediately multiplied by the resident output weight.
# ---------------------------------------------------------------------------
def _rel_attention_kernel(q_ref, k_ref, v_ref, rk_ref, rv_ref, wo_ref, bo_ref,
                          o_ref, *, length, q_rows, num_heads, head_channels):
    L, TQ, H, Dh = length, q_rows, num_heads, head_channels
    scale = 1.0 / math.sqrt(Dh)
    contract_last = (((1,), (1,)), ((), ()))
    row0 = pl.program_id(1) * TQ                # global q-row offset of this tile

    # Per-row circular shift amount k = (L-1) - i is shared by BOTH skew
    # directions; precompute its bit-decomposition select masks once and reuse
    # across every head (hoisted out of the head loop; JAX does not CSE these).
    a = lax.broadcasted_iota(jnp.int32, (TQ, 1), 0)
    kshift = (L - 1) - (row0 + a)               # in [0, L-1]
    nbits = max((L - 1).bit_length(), 0)
    bit_masks = [jnp.broadcast_to((kshift & (1 << bit)) != 0, (TQ, 2 * L))
                 for bit in range(nbits)]

    q_all = q_ref[0] * scale                    # fold 1/sqrt(Dh) into q once
    k_all = k_ref[0]                            # (L,  H*Dh)
    v_all = v_ref[0]                            # (L,  H*Dh)

    outs = []
    for h in range(H):
        cols = slice(h * Dh, (h + 1) * Dh)
        q = q_all[:, cols]                      # (TQ, Dh), already scaled
        k = k_all[:, cols]                      # (L,  Dh)
        v = v_all[:, cols]                      # (L,  Dh)
        rk = rk_ref[h]                          # (2L, Dh), last row zero
        rv = rv_ref[h]                          # (2L, Dh), last row zero

        # score = q k^T ; relative-K term via skewed q rel_k^T     (all on MXU)
        score = lax.dot_general(q, k, contract_last,
                                preferred_element_type=jnp.float32)      # (TQ, L)
        s_rel = lax.dot_general(q, rk, contract_last,
                                preferred_element_type=jnp.float32)      # (TQ, 2L)
        score = score + _skew_rel_to_abs(s_rel, bit_masks, L)

        # TODO(synk): attn_mask (masked_fill with -1e5) not implemented; mask=None path only.
        score = score - jnp.max(score, axis=-1, keepdims=True)
        num = jnp.exp(score)
        prob = num * pl.reciprocal(jnp.sum(num, axis=-1, keepdims=True), approx=True)
        # TODO(synk): dropout runs in eval mode (identity); no RNG applied.

        res = jnp.dot(prob, v, preferred_element_type=jnp.float32)       # (TQ, Dh)
        rel_w = _skew_abs_to_rel(prob, bit_masks, L)                     # (TQ, 2L)
        res = res + jnp.dot(rel_w, rv, preferred_element_type=jnp.float32)
        outs.append(res)

    # merged-head result -> fused output projection (weights VMEM-resident);
    # the (B, L, C) attention intermediate never touches HBM.
    res_merged = jnp.concatenate(outs, axis=-1)                          # (TQ, C)
    out = jnp.dot(res_merged, wo_ref[...],
                  preferred_element_type=jnp.float32) + bo_ref[...]      # (TQ, O)
    o_ref[0] = out.astype(o_ref.dtype)


def rel_attention(q, k, v, rel_k, rel_v, wo, bo, num_heads, *, tile_q=256):
    """q, k, v: (B, L, C) channels-last, merged heads; rel_k/rel_v: (H, 2L, Dh)
    (zero-padded last row); wo: (C, O), bo: (1, O).
    Returns (B, L, O) = output-projected attention."""
    B, L, C = q.shape
    O = wo.shape[1]
    H = num_heads
    Dh = C // H
    TQ = L if L <= tile_q else tile_q
    nq = pl.cdiv(L, TQ)

    kernel = functools.partial(_rel_attention_kernel,
                               length=L, q_rows=TQ, num_heads=H, head_channels=Dh)
    q_spec = pl.BlockSpec((1, TQ, C), lambda b, qi: (b, qi, 0))
    kv_spec = pl.BlockSpec((1, L, C), lambda b, qi: (b, 0, 0))        # resident across q-tiles
    rel_spec = pl.BlockSpec((H, 2 * L, Dh), lambda b, qi: (0, 0, 0))  # never refetched
    wo_spec = pl.BlockSpec((C, O), lambda b, qi: (0, 0))              # resident output weight
    bo_spec = pl.BlockSpec((1, O), lambda b, qi: (0, 0))
    return pl.pallas_call(
        kernel,
        out_shape=jax.ShapeDtypeStruct((B, L, O), jnp.float32),
        grid=(B, nq),
        in_specs=[q_spec, kv_spec, kv_spec, rel_spec, rel_spec, wo_spec, bo_spec],
        out_specs=pl.BlockSpec((1, TQ, O), lambda b, qi: (b, qi, 0)),
        compiler_params=pltpu.CompilerParams(
            dimension_semantics=("parallel", "parallel")),
    )(q, k, v, rel_k, rel_v, wo, bo)


# ---------------------------------------------------------------------------
# Module wrapper (parameter setup + glue reshapes in plain JAX, jitted)
# ---------------------------------------------------------------------------
class RelativeMultiHeadAttentionPallas:
    def __init__(self, num_heads, out_channels, hidden_channels, p_dropout,
                 relative_window_size, key):
        assert hidden_channels % num_heads == 0
        assert relative_window_size is not None  # this kernel implements the relative variant
        self.num_heads = num_heads
        self.out_channels = out_channels
        self.hidden_channels = hidden_channels
        self.head_channels = hidden_channels // num_heads
        self.relative_window_size = relative_window_size
        self.p_dropout = p_dropout  # identity at eval time

        ks = jax.random.split(key, 10)

        def xavier(k, cin, cout):
            bound = math.sqrt(6.0 / (cin + cout))
            return jax.random.uniform(k, (cin, cout), jnp.float32, -bound, bound)

        def bias(k, cin, cout):
            bound = 1.0 / math.sqrt(cin)
            return jax.random.uniform(k, (cout,), jnp.float32, -bound, bound)

        C, O = hidden_channels, out_channels
        rel_std = self.head_channels ** (-0.5)
        W = relative_window_size
        p = {
            "wq": xavier(ks[0], C, C), "bq": bias(ks[1], C, C),
            "wk": xavier(ks[2], C, C), "bk": bias(ks[3], C, C),
            "wv": xavier(ks[4], C, C), "bv": bias(ks[5], C, C),
            # convo: torch default (kaiming-uniform-ish); deterministic uniform here
            "wo": xavier(ks[6], C, O), "bo": bias(ks[7], C, O),
            "emb_rel_k": jax.random.normal(ks[8], (num_heads, 2 * W + 1, self.head_channels),
                                           jnp.float32) * rel_std,
            "emb_rel_v": jax.random.normal(ks[9], (num_heads, 2 * W + 1, self.head_channels),
                                           jnp.float32) * rel_std,
        }
        # fused q|k|v projection weights (single pass over x)
        p["wqkv"] = jnp.concatenate([p["wq"], p["wk"], p["wv"]], axis=1)   # (C, 3C)
        p["bqkv"] = jnp.concatenate([p["bq"], p["bk"], p["bv"]], axis=0)   # (3C,)
        self.params = p
        self._jit_forward = jax.jit(self._forward)

    def params_np(self):
        return {k: np.asarray(v) for k, v in self.params.items()}

    def _get_relative_embeddings(self, emb, length):
        W = self.relative_window_size
        pad_len = max(0, length - W - 1)
        start = max(0, W - length + 1)
        padded = jnp.pad(emb, ((0, 0), (pad_len, pad_len), (0, 0)))
        return padded[:, start:start + 2 * length - 1, :]

    def _forward(self, x, params):
        p = params
        B, C, L = x.shape
        H = self.num_heads

        x_flat = jnp.transpose(x, (0, 2, 1)).reshape(B * L, C)       # (B*L, C)
        qkv = linear_1x1(x_flat, p["wqkv"], p["bqkv"])               # fused q|k|v: (B*L, 3C)
        q, k, v = jnp.split(qkv, 3, axis=1)
        q = q.reshape(B, L, C)
        k = k.reshape(B, L, C)
        v = v.reshape(B, L, C)

        rel_k = self._get_relative_embeddings(p["emb_rel_k"], L)     # (H, 2L-1, Dh)
        rel_v = self._get_relative_embeddings(p["emb_rel_v"], L)
        # zero-pad to 2L rows so all in-kernel skew widths are even; the extra
        # row is mathematically inert (never selected / multiplied by 0).
        rel_k = jnp.pad(rel_k, ((0, 0), (0, 1), (0, 0)))
        rel_v = jnp.pad(rel_v, ((0, 0), (0, 1), (0, 0)))

        out = rel_attention(q, k, v, rel_k, rel_v,
                            p["wo"], p["bo"].reshape(1, -1), H)      # (B, L, O)
        return jnp.transpose(out, (0, 2, 1))                         # (B, O, L)

    def __call__(self, x):
        """x: (B, C, L) float32 -> (B, out_channels, L) float32."""
        return self._jit_forward(x, self.params)


# ---------------------------------------------------------------------------
# NumPy reference (mirrors the PyTorch forward exactly, in float64)
# ---------------------------------------------------------------------------
def _ref_forward_np(x, p, num_heads, window):
    x = np.asarray(x, np.float64)
    p = {k: np.asarray(v, np.float64) for k, v in p.items()}
    B, C, L = x.shape
    Dh = C // num_heads

    def conv(x, w, b):
        return np.einsum("bcl,co->bol", x, w) + b[None, :, None]

    q, k, v = (conv(x, p["wq"], p["bq"]), conv(x, p["wk"], p["bk"]), conv(x, p["wv"], p["bv"]))

    def split(t):  # (B, C, L) -> (B, H, L, Dh)  (torch: view + transpose(2,3))
        return t.reshape(B, num_heads, Dh, L).transpose(0, 1, 3, 2)

    qh, kh, vh = split(q), split(k), split(v)
    score = np.einsum("bhld,bhmd->bhlm", qh, kh) / math.sqrt(Dh)

    def get_rel(emb, length):
        pad_len = max(0, length - window - 1)
        start = max(0, window - length + 1)
        padded = np.pad(emb, ((0, 0), (pad_len, pad_len), (0, 0)))
        return padded[:, start:start + 2 * length - 1, :]

    rk, rv = get_rel(p["emb_rel_k"], L), get_rel(p["emb_rel_v"], L)
    s_rel = np.einsum("bhld,hrd->bhlr", qh, rk)
    # _relative_to_absolute
    s = np.pad(s_rel, ((0, 0), (0, 0), (0, 0), (0, 1))).reshape(B, num_heads, L * 2 * L)
    s = np.pad(s, ((0, 0), (0, 0), (0, L - 1))).reshape(B, num_heads, L + 1, 2 * L - 1)
    s_abs = s[:, :, :L, L - 1:]
    score = score + s_abs / math.sqrt(Dh)

    score = score - score.max(-1, keepdims=True)
    e = np.exp(score)
    prob = e / e.sum(-1, keepdims=True)
    res = np.einsum("bhlm,bhmd->bhld", prob, vh)
    # _absolute_to_relative
    sc = np.pad(prob, ((0, 0), (0, 0), (0, 0), (0, L - 1))).reshape(B, num_heads, -1)
    sc = np.pad(sc, ((0, 0), (0, 0), (L, 0))).reshape(B, num_heads, L, 2 * L)[:, :, :, 1:]
    res = res + np.einsum("bhlr,hrd->bhld", sc, rv)

    res = res.transpose(0, 1, 3, 2).reshape(B, C, L)
    return np.einsum("bcl,co->bol", res, p["wo"]) + p["bo"][None, :, None]


# ---------------------------------------------------------------------------
if __name__ == "__main__":
    B, L = 2, 16
    num_heads, hidden_channels, out_channels = 4, 32, 32
    window = 4

    key = jax.random.PRNGKey(0)
    kx, kp = jax.random.split(key)
    x = jax.random.normal(kx, (B, hidden_channels, L), jnp.float32)

    module = RelativeMultiHeadAttentionPallas(
        num_heads=num_heads,
        out_channels=out_channels,
        hidden_channels=hidden_channels,
        p_dropout=0.0,
        relative_window_size=window,
        key=kp,
    )

    out = jax.block_until_ready(module(x))
    assert out.shape == (B, out_channels, L), out.shape

    ref = _ref_forward_np(np.asarray(x), module.params_np(), num_heads, window)
    err = float(np.max(np.abs(np.asarray(out, np.float64) - ref)))
    assert err < 2e-2, f"max abs error too large: {err}"

    print("KERNEL_OK")
</pallas_src>

<mosaic_0001>
module attributes {stable_mosaic.version = 11 : i64} {
  func.func @_linear_kernel(%arg0: i32, %arg1: memref<32x32xf32, #tpu.memory_space<vmem>>, %arg2: memref<32x96xf32, #tpu.memory_space<vmem>>, %arg3: memref<1x96xf32, #tpu.memory_space<vmem>>, %arg4: memref<32x96xf32, #tpu.memory_space<vmem>>) attributes {dimension_semantics = [#tpu.dimension_semantics<parallel>], iteration_bounds = array<i64: 1>, scalar_prefetch = 0 : i64, scratch_operands = 0 : i64, tpu.core_type = #tpu.core_type<tc>, window_params = [{transform_indices = @transform_0, window_bounds = array<i64: 32, 32>}, {pipeline_mode = #tpu.pipeline_mode<synchronous>, transform_indices = @transform_1, window_bounds = array<i64: 32, 96>}, {pipeline_mode = #tpu.pipeline_mode<synchronous>, transform_indices = @transform_2, window_bounds = array<i64: 1, 96>}, {transform_indices = @transform_3, window_bounds = array<i64: 32, 96>}]} {
    %c0 = arith.constant 0 : index
    %c0_0 = arith.constant 0 : index
    %0 = vector.load %arg1[%c0, %c0_0] : memref<32x32xf32, #tpu.memory_space<vmem>>, vector<32x32xf32>
    %c0_1 = arith.constant 0 : index
    %c0_2 = arith.constant 0 : index
    %1 = vector.load %arg2[%c0_1, %c0_2] : memref<32x96xf32, #tpu.memory_space<vmem>>, vector<32x96xf32>
    %cst = arith.constant dense<0.000000e+00> : vector<32x96xf32>
    %2 = tpu.matmul %0, %1, %cst {dimension_numbers = #tpu.dot_dimension_numbers<[1], [0], [0], [1], [0, 0, 1, 1], [], []>} : vector<32x32xf32>, vector<32x96xf32>, vector<32x96xf32> -> vector<32x96xf32>
    %c0_3 = arith.constant 0 : index
    %c0_4 = arith.constant 0 : index
    %3 = vector.load %arg3[%c0_3, %c0_4] : memref<1x96xf32, #tpu.memory_space<vmem>>, vector<1x96xf32>
    %4 = vector.broadcast %3 : vector<1x96xf32> to vector<32x96xf32>
    %5 = arith.addf %2, %4 : vector<32x96xf32>
    %c0_5 = arith.constant 0 : index
    %c0_6 = arith.constant 0 : index
    %6 = vector.load %arg4[%c0_5, %c0_6] : memref<32x96xf32, #tpu.memory_space<vmem>>, vector<32x96xf32>
    tpu.vector_store %arg4[%c0_5, %c0_6], %5 {strides = array<i32>} : memref<32x96xf32, #tpu.memory_space<vmem>>, vector<32x96xf32>,
    return
  }
  func.func @transform_0(%arg0: i32) -> (i32, i32) {
    %c0_i32 = arith.constant 0 : i32
    %c0_i32_0 = arith.constant 0 : i32
    return %arg0, %c0_i32 : i32, i32
  }
  func.func @transform_1(%arg0: i32) -> (i32, i32) {
    %c0_i32 = arith.constant 0 : i32
    %c0_i32_0 = arith.constant 0 : i32
    %c0_i32_1 = arith.constant 0 : i32
    return %c0_i32, %c0_i32_0 : i32, i32
  }
  func.func @transform_2(%arg0: i32) -> (i32, i32) {
    %c0_i32 = arith.constant 0 : i32
    %c0_i32_0 = arith.constant 0 : i32
    %c0_i32_1 = arith.constant 0 : i32
    return %c0_i32, %c0_i32_0 : i32, i32
  }
  func.func @transform_3(%arg0: i32) -> (i32, i32) {
    %c0_i32 = arith.constant 0 : i32
    %c0_i32_0 = arith.constant 0 : i32
    return %arg0, %c0_i32 : i32, i32
  }
}

module attributes {stable_mosaic.version = 11 : i64} {
  func.func @_rel_attention_kernel(%arg0: i32, %arg1: i32, %arg2: memref<1x16x32xf32, #tpu.memory_space<vmem>>, %arg3: memref<1x16x32xf32, #tpu.memory_space<vmem>>, %arg4: memref<1x16x32xf32, #tpu.memory_space<vmem>>, %arg5: memref<4x32x8xf32, #tpu.memory_space<vmem>>, %arg6: memref<4x32x8xf32, #tpu.memory_space<vmem>>, %arg7: memref<32x32xf32, #tpu.memory_space<vmem>>, %arg8: memref<1x32xf32, #tpu.memory_space<vmem>>, %arg9: memref<1x16x32xf32, #tpu.memory_space<vmem>>) attributes {dimension_semantics = [#tpu.dimension_semantics<parallel>, #tpu.dimension_semantics<parallel>], iteration_bounds = array<i64: 2, 1>, scalar_prefetch = 0 : i64, scratch_operands = 0 : i64, tpu.core_type = #tpu.core_type<tc>, window_params = [{transform_indices = @transform_0, window_bounds = array<i64: 1, 16, 32>}, {transform_indices = @transform_1, window_bounds = array<i64: 1, 16, 32>}, {transform_indices = @transform_2, window_bounds = array<i64: 1, 16, 32>}, {pipeline_mode = #tpu.pipeline_mode<synchronous>, transform_indices = @transform_3, window_bounds = array<i64: 4, 32, 8>}, {pipeline_mode = #tpu.pipeline_mode<synchronous>, transform_indices = @transform_4, window_bounds = array<i64: 4, 32, 8>}, {pipeline_mode = #tpu.pipeline_mode<synchronous>, transform_indices = @transform_5, window_bounds = array<i64: 32, 32>}, {pipeline_mode = #tpu.pipeline_mode<synchronous>, transform_indices = @transform_6, window_bounds = array<i64: 1, 32>}, {transform_indices = @transform_7, window_bounds = array<i64: 1, 16, 32>}]} {
    %c16_i32 = arith.constant 16 : i32
    %0 = arith.muli %arg1, %c16_i32 : i32
    %1 = tpu.iota {dimensions = array<i32: 0>} : vector<16x1xi32>
    %2 = vector.broadcast %0 : i32 to vector<16x1xi32>
    %3 = arith.addi %2, %1 : vector<16x1xi32>
    %c15_i32 = arith.constant 15 : i32
    %4 = vector.broadcast %c15_i32 : i32 to vector<16x1xi32>
    %5 = arith.subi %4, %3 : vector<16x1xi32>
    %c1_i32 = arith.constant 1 : i32
    %6 = vector.broadcast %c1_i32 : i32 to vector<16x1xi32>
    %7 = arith.andi %5, %6 : vector<16x1xi32>
    %c0_i32 = arith.constant 0 : i32
    %8 = vector.broadcast %c0_i32 : i32 to vector<16x1xi32>
    %9 = arith.cmpi ne, %7, %8 : vector<16x1xi32>
    %10 = vector.shape_cast %9 : vector<16x1xi1> to vector<16x1xi1>
    %11 = vector.broadcast %10 : vector<16x1xi1> to vector<16x32xi1>
    %c2_i32 = arith.constant 2 : i32
    %12 = vector.broadcast %c2_i32 : i32 to vector<16x1xi32>
    %13 = arith.andi %5, %12 : vector<16x1xi32>
    %c0_i32_0 = arith.constant 0 : i32
    %14 = vector.broadcast %c0_i32_0 : i32 to vector<16x1xi32>
    %15 = arith.cmpi ne, %13, %14 : vector<16x1xi32>
    %16 = vector.shape_cast %15 : vector<16x1xi1> to vector<16x1xi1>
    %17 = vector.broadcast %16 : vector<16x1xi1> to vector<16x32xi1>
    %c4_i32 = arith.constant 4 : i32
    %18 = vector.broadcast %c4_i32 : i32 to vector<16x1xi32>
    %19 = arith.andi %5, %18 : vector<16x1xi32>
    %c0_i32_1 = arith.constant 0 : i32
    %20 = vector.broadcast %c0_i32_1 : i32 to vector<16x1xi32>
    %21 = arith.cmpi ne, %19, %20 : vector<16x1xi32>
    %22 = vector.shape_cast %21 : vector<16x1xi1> to vector<16x1xi1>
    %23 = vector.broadcast %22 : vector<16x1xi1> to vector<16x32xi1>
    %c8_i32 = arith.constant 8 : i32
    %24 = vector.broadcast %c8_i32 : i32 to vector<16x1xi32>
    %25 = arith.andi %5, %24 : vector<16x1xi32>
    %c0_i32_2 = arith.constant 0 : i32
    %26 = vector.broadcast %c0_i32_2 : i32 to vector<16x1xi32>
    %27 = arith.cmpi ne, %25, %26 : vector<16x1xi32>
    %28 = vector.shape_cast %27 : vector<16x1xi1> to vector<16x1xi1>
    %29 = vector.broadcast %28 : vector<16x1xi1> to vector<16x32xi1>
    %c0 = arith.constant 0 : index
    %c0_3 = arith.constant 0 : index
    %c0_4 = arith.constant 0 : index
    %30 = vector.load %arg2[%c0, %c0_3, %c0_4] : memref<1x16x32xf32, #tpu.memory_space<vmem>>, vector<1x16x32xf32>
    %31 = vector.shape_cast %30 : vector<1x16x32xf32> to vector<16x32xf32>
    %cst = arith.constant 0.353553385 : f32
    %32 = vector.broadcast %cst : f32 to vector<16x32xf32>
    %33 = arith.mulf %31, %32 : vector<16x32xf32>
    %c0_5 = arith.constant 0 : index
    %c0_6 = arith.constant 0 : index
    %c0_7 = arith.constant 0 : index
    %34 = vector.load %arg3[%c0_5, %c0_6, %c0_7] : memref<1x16x32xf32, #tpu.memory_space<vmem>>, vector<1x16x32xf32>
    %35 = vector.shape_cast %34 : vector<1x16x32xf32> to vector<16x32xf32>
    %c0_8 = arith.constant 0 : index
    %c0_9 = arith.constant 0 : index
    %c0_10 = arith.constant 0 : index
    %36 = vector.load %arg4[%c0_8, %c0_9, %c0_10] : memref<1x16x32xf32, #tpu.memory_space<vmem>>, vector<1x16x32xf32>
    %37 = vector.shape_cast %36 : vector<1x16x32xf32> to vector<16x32xf32>
    %38 = vector.extract_strided_slice %33 {offsets = [0, 0], sizes = [16, 8], strides = [1, 1]} : vector<16x32xf32> to vector<16x8xf32>
    %39 = vector.extract_strided_slice %35 {offsets = [0, 0], sizes = [16, 8], strides = [1, 1]} : vector<16x32xf32> to vector<16x8xf32>
    %40 = vector.extract_strided_slice %37 {offsets = [0, 0], sizes = [16, 8], strides = [1, 1]} : vector<16x32xf32> to vector<16x8xf32>
    %c0_11 = arith.constant 0 : index
    %c0_12 = arith.constant 0 : index
    %c0_13 = arith.constant 0 : index
    %41 = vector.load %arg5[%c0_11, %c0_12, %c0_13] : memref<4x32x8xf32, #tpu.memory_space<vmem>>, vector<1x32x8xf32>
    %42 = vector.shape_cast %41 : vector<1x32x8xf32> to vector<32x8xf32>
    %c0_14 = arith.constant 0 : index
    %c0_15 = arith.constant 0 : index
    %c0_16 = arith.constant 0 : index
    %43 = vector.load %arg6[%c0_14, %c0_15, %c0_16] : memref<4x32x8xf32, #tpu.memory_space<vmem>>, vector<1x32x8xf32>
    %44 = vector.shape_cast %43 : vector<1x32x8xf32> to vector<32x8xf32>
    %cst_17 = arith.constant dense<0.000000e+00> : vector<16x16xf32>
    %45 = tpu.matmul %38, %39, %cst_17 {dimension_numbers = #tpu.dot_dimension_numbers<[1], [1], [0], [0], [0, 0, 1, 0], [], []>} : vector<16x8xf32>, vector<16x8xf32>, vector<16x16xf32> -> vector<16x16xf32>
    %cst_18 = arith.constant dense<0.000000e+00> : vector<16x32xf32>
    %46 = tpu.matmul %38, %42, %cst_18 {dimension_numbers = #tpu.dot_dimension_numbers<[1], [1], [0], [0], [0, 0, 1, 0], [], []>} : vector<16x8xf32>, vector<32x8xf32>, vector<16x32xf32> -> vector<16x32xf32>
    %47 = vector.extract_strided_slice %46 {offsets = [0, 1], sizes = [16, 31], strides = [1, 1]} : vector<16x32xf32> to vector<16x31xf32>
    %48 = vector.extract_strided_slice %46 {offsets = [0, 0], sizes = [16, 1], strides = [1, 1]} : vector<16x32xf32> to vector<16x1xf32>
    %49 = tpu.concatenate %47, %48 in 1 : vector<16x31xf32>, vector<16x1xf32> -> vector<16x32xf32>
    %50 = arith.select %11, %49, %46 : vector<16x32xi1>, vector<16x32xf32>
    %51 = vector.extract_strided_slice %50 {offsets = [0, 2], sizes = [16, 30], strides = [1, 1]} : vector<16x32xf32> to vector<16x30xf32>
    %52 = vector.extract_strided_slice %50 {offsets = [0, 0], sizes = [16, 2], strides = [1, 1]} : vector<16x32xf32> to vector<16x2xf32>
    %53 = tpu.concatenate %51, %52 in 1 : vector<16x30xf32>, vector<16x2xf32> -> vector<16x32xf32>
    %54 = arith.select %17, %53, %50 : vector<16x32xi1>, vector<16x32xf32>
    %55 = vector.extract_strided_slice %54 {offsets = [0, 4], sizes = [16, 28], strides = [1, 1]} : vector<16x32xf32> to vector<16x28xf32>
    %56 = vector.extract_strided_slice %54 {offsets = [0, 0], sizes = [16, 4], strides = [1, 1]} : vector<16x32xf32> to vector<16x4xf32>
    %57 = tpu.concatenate %55, %56 in 1 : vector<16x28xf32>, vector<16x4xf32> -> vector<16x32xf32>
    %58 = arith.select %23, %57, %54 : vector<16x32xi1>, vector<16x32xf32>
    %59 = vector.extract_strided_slice %58 {offsets = [0, 8], sizes = [16, 24], strides = [1, 1]} : vector<16x32xf32> to vector<16x24xf32>
    %60 = vector.extract_strided_slice %58 {offsets = [0, 0], sizes = [16, 8], strides = [1, 1]} : vector<16x32xf32> to vector<16x8xf32>
    %61 = tpu.concatenate %59, %60 in 1 : vector<16x24xf32>, vector<16x8xf32> -> vector<16x32xf32>
    %62 = arith.select %29, %61, %58 : vector<16x32xi1>, vector<16x32xf32>
    %63 = vector.extract_strided_slice %62 {offsets = [0, 0], sizes = [16, 16], strides = [1, 1]} : vector<16x32xf32> to vector<16x16xf32>
    %64 = arith.addf %45, %63 : vector<16x16xf32>
    %cst_19 = arith.constant dense<0xFF800000> : vector<16xf32>
    %65 = vector.multi_reduction <maximumf>, %64, %cst_19 [1] : vector<16x16xf32> to vector<16xf32>
    %66 = vector.shape_cast %65 : vector<16xf32> to vector<16x1xf32>
    %67 = vector.broadcast %66 : vector<16x1xf32> to vector<16x16xf32>
    %68 = arith.subf %64, %67 : vector<16x16xf32>
    %69 = math.exp %68 : vector<16x16xf32>
    %cst_20 = arith.constant dense<0.000000e+00> : vector<16xf32>
    %70 = vector.multi_reduction <add>, %69, %cst_20 [1] : vector<16x16xf32> to vector<16xf32>
    %71 = vector.shape_cast %70 : vector<16xf32> to vector<16x1xf32>
    %72 = tpu.reciprocal %71 {approx = true} : vector<16x1xf32> -> vector<16x1xf32>
    %73 = vector.broadcast %72 : vector<16x1xf32> to vector<16x16xf32>
    %74 = arith.mulf %69, %73 : vector<16x16xf32>
    %cst_21 = arith.constant dense<0.000000e+00> : vector<16x8xf32>
    %75 = tpu.matmul %74, %40, %cst_21 {dimension_numbers = #tpu.dot_dimension_numbers<[1], [0], [0], [1], [0, 0, 1, 1], [], []>} : vector<16x16xf32>, vector<16x8xf32>, vector<16x8xf32> -> vector<16x8xf32>
    %cst_22 = arith.constant 0.000000e+00 : f32
    %76 = vector.broadcast %cst_22 : f32 to vector<16x16xf32>
    %77 = tpu.concatenate %74, %76 in 1 : vector<16x16xf32>, vector<16x16xf32> -> vector<16x32xf32>
    %78 = vector.extract_strided_slice %77 {offsets = [0, 31], sizes = [16, 1], strides = [1, 1]} : vector<16x32xf32> to vector<16x1xf32>
    %79 = vector.extract_strided_slice %77 {offsets = [0, 0], sizes = [16, 31], strides = [1, 1]} : vector<16x32xf32> to vector<16x31xf32>
    %80 = tpu.concatenate %78, %79 in 1 : vector<16x1xf32>, vector<16x31xf32> -> vector<16x32xf32>
    %81 = arith.select %11, %80, %77 : vector<16x32xi1>, vector<16x32xf32>
    %82 = vector.extract_strided_slice %81 {offsets = [0, 30], sizes = [16, 2], strides = [1, 1]} : vector<16x32xf32> to vector<16x2xf32>
    %83 = vector.extract_strided_slice %81 {offsets = [0, 0], sizes = [16, 30], strides = [1, 1]} : vector<16x32xf32> to vector<16x30xf32>
    %84 = tpu.concatenate %82, %83 in 1 : vector<16x2xf32>, vector<16x30xf32> -> vector<16x32xf32>
    %85 = arith.select %17, %84, %81 : vector<16x32xi1>, vector<16x32xf32>
    %86 = vector.extract_strided_slice %85 {offsets = [0, 28], sizes = [16, 4], strides = [1, 1]} : vector<16x32xf32> to vector<16x4xf32>
    %87 = vector.extract_strided_slice %85 {offsets = [0, 0], sizes = [16, 28], strides = [1, 1]} : vector<16x32xf32> to vector<16x28xf32>
    %88 = tpu.concatenate %86, %87 in 1 : vector<16x4xf32>, vector<16x28xf32> -> vector<16x32xf32>
    %89 = arith.select %23, %88, %85 : vector<16x32xi1>, vector<16x32xf32>
    %90 = vector.extract_strided_slice %89 {offsets = [0, 24], sizes = [16, 8], strides = [1, 1]} : vector<16x32xf32> to vector<16x8xf32>
    %91 = vector.extract_strided_slice %89 {offsets = [0, 0], sizes = [16, 24], strides = [1, 1]} : vector<16x32xf32> to vector<16x24xf32>
    %92 = tpu.concatenate %90, %91 in 1 : vector<16x8xf32>, vector<16x24xf32> -> vector<16x32xf32>
    %93 = arith.select %29, %92, %89 : vector<16x32xi1>, vector<16x32xf32>
    %cst_23 = arith.constant dense<0.000000e+00> : vector<16x8xf32>
    %94 = tpu.matmul %93, %44, %cst_23 {dimension_numbers = #tpu.dot_dimension_numbers<[1], [0], [0], [1], [0, 0, 1, 1], [], []>} : vector<16x32xf32>, vector<32x8xf32>, vector<16x8xf32> -> vector<16x8xf32>
    %95 = arith.addf %75, %94 : vector<16x8xf32>
    %96 = vector.extract_strided_slice %33 {offsets = [0, 8], sizes = [16, 8], strides = [1, 1]} : vector<16x32xf32> to vector<16x8xf32>
    %97 = vector.extract_strided_slice %35 {offsets = [0, 8], sizes = [16, 8], strides = [1, 1]} : vector<16x32xf32> to vector<16x8xf32>
    %98 = vector.extract_strided_slice %37 {offsets = [0, 8], sizes = [16, 8], strides = [1, 1]} : vector<16x32xf32> to vector<16x8xf32>
    %c1 = arith.constant 1 : index
    %c0_24 = arith.constant 0 : index
    %c0_25 = arith.constant 0 : index
    %99 = vector.load %arg5[%c1, %c0_24, %c0_25] : memref<4x32x8xf32, #tpu.memory_space<vmem>>, vector<1x32x8xf32>
    %100 = vector.shape_cast %99 : vector<1x32x8xf32> to vector<32x8xf32>
    %c1_26 = arith.constant 1 : index
    %c0_27 = arith.constant 0 : index
    %c0_28 = arith.constant 0 : index
    %101 = vector.load %arg6[%c1_26, %c0_27, %c0_28] : memref<4x32x8xf32, #tpu.memory_space<vmem>>, vector<1x32x8xf32>
    %102 = vector.shape_cast %101 : vector<1x32x8xf32> to vector<32x8xf32>
    %cst_29 = arith.constant dense<0.000000e+00> : vector<16x16xf32>
    %103 = tpu.matmul %96, %97, %cst_29 {dimension_numbers = #tpu.dot_dimension_numbers<[1], [1], [0], [0], [0, 0, 1, 0], [], []>} : vector<16x8xf32>, vector<16x8xf32>, vector<16x16xf32> -> vector<16x16xf32>
    %cst_30 = arith.constant dense<0.000000e+00> : vector<16x32xf32>
    %104 = tpu.matmul %96, %100, %cst_30 {dimension_numbers = #tpu.dot_dimension_numbers<[1], [1], [0], [0], [0, 0, 1, 0], [], []>} : vector<16x8xf32>, vector<32x8xf32>, vector<16x32xf32> -> vector<16x32xf32>
    %105 = vector.extract_strided_slice %104 {offsets = [0, 1], sizes = [16, 31], strides = [1, 1]} : vector<16x32xf32> to vector<16x31xf32>
    %106 = vector.extract_strided_slice %104 {offsets = [0, 0], sizes = [16, 1], strides = [1, 1]} : vector<16x32xf32> to vector<16x1xf32>
    %107 = tpu.concatenate %105, %106 in 1 : vector<16x31xf32>, vector<16x1xf32> -> vector<16x32xf32>
    %108 = arith.select %11, %107, %104 : vector<16x32xi1>, vector<16x32xf32>
    %109 = vector.extract_strided_slice %108 {offsets = [0, 2], sizes = [16, 30], strides = [1, 1]} : vector<16x32xf32> to vector<16x30xf32>
    %110 = vector.extract_strided_slice %108 {offsets = [0, 0], sizes = [16, 2], strides = [1, 1]} : vector<16x32xf32> to vector<16x2xf32>
    %111 = tpu.concatenate %109, %110 in 1 : vector<16x30xf32>, vector<16x2xf32> -> vector<16x32xf32>
    %112 = arith.select %17, %111, %108 : vector<16x32xi1>, vector<16x32xf32>
    %113 = vector.extract_strided_slice %112 {offsets = [0, 4], sizes = [16, 28], strides = [1, 1]} : vector<16x32xf32> to vector<16x28xf32>
    %114 = vector.extract_strided_slice %112 {offsets = [0, 0], sizes = [16, 4], strides = [1, 1]} : vector<16x32xf32> to vector<16x4xf32>
    %115 = tpu.concatenate %113, %114 in 1 : vector<16x28xf32>, vector<16x4xf32> -> vector<16x32xf32>
    %116 = arith.select %23, %115, %112 : vector<16x32xi1>, vector<16x32xf32>
    %117 = vector.extract_strided_slice %116 {offsets = [0, 8], sizes = [16, 24], strides = [1, 1]} : vector<16x32xf32> to vector<16x24xf32>
    %118 = vector.extract_strided_slice %116 {offsets = [0, 0], sizes = [16, 8], strides = [1, 1]} : vector<16x32xf32> to vector<16x8xf32>
    %119 = tpu.concatenate %117, %118 in 1 : vector<16x24xf32>, vector<16x8xf32> -> vector<16x32xf32>
    %120 = arith.select %29, %119, %116 : vector<16x32xi1>, vector<16x32xf32>
    %121 = vector.extract_strided_slice %120 {offsets = [0, 0], sizes = [16, 16], strides = [1, 1]} : vector<16x32xf32> to vector<16x16xf32>
    %122 = arith.addf %103, %121 : vector<16x16xf32>
    %cst_31 = arith.constant dense<0xFF800000> : vector<16xf32>
    %123 = vector.multi_reduction <maximumf>, %122, %cst_31 [1] : vector<16x16xf32> to vector<16xf32>
    %124 = vector.shape_cast %123 : vector<16xf32> to vector<16x1xf32>
    %125 = vector.broadcast %124 : vector<16x1xf32> to vector<16x16xf32>
    %126 = arith.subf %122, %125 : vector<16x16xf32>
    %127 = math.exp %126 : vector<16x16xf32>
    %cst_32 = arith.constant dense<0.000000e+00> : vector<16xf32>
    %128 = vector.multi_reduction <add>, %127, %cst_32 [1] : vector<16x16xf32> to vector<16xf32>
    %129 = vector.shape_cast %128 : vector<16xf32> to vector<16x1xf32>
    %130 = tpu.reciprocal %129 {approx = true} : vector<16x1xf32> -> vector<16x1xf32>
    %131 = vector.broadcast %130 : vector<16x1xf32> to vector<16x16xf32>
    %132 = arith.mulf %127, %131 : vector<16x16xf32>
    %cst_33 = arith.constant dense<0.000000e+00> : vector<16x8xf32>
    %133 = tpu.matmul %132, %98, %cst_33 {dimension_numbers = #tpu.dot_dimension_numbers<[1], [0], [0], [1], [0, 0, 1, 1], [], []>} : vector<16x16xf32>, vector<16x8xf32>, vector<16x8xf32> -> vector<16x8xf32>
    %cst_34 = arith.constant 0.000000e+00 : f32
    %134 = vector.broadcast %cst_34 : f32 to vector<16x16xf32>
    %135 = tpu.concatenate %132, %134 in 1 : vector<16x16xf32>, vector<16x16xf32> -> vector<16x32xf32>
    %136 = vector.extract_strided_slice %135 {offsets = [0, 31], sizes = [16, 1], strides = [1, 1]} : vector<16x32xf32> to vector<16x1xf32>
    %137 = vector.extract_strided_slice %135 {offsets = [0, 0], sizes = [16, 31], strides = [1, 1]} : vector<16x32xf32> to vector<16x31xf32>
    %138 = tpu.concatenate %136, %137 in 1 : vector<16x1xf32>, vector<16x31xf32> -> vector<16x32xf32>
    %139 = arith.select %11, %138, %135 : vector<16x32xi1>, vector<16x32xf32>
    %140 = vector.extract_strided_slice %139 {offsets = [0, 30], sizes = [16, 2], strides = [1, 1]} : vector<16x32xf32> to vector<16x2xf32>
    %141 = vector.extract_strided_slice %139 {offsets = [0, 0], sizes = [16, 30], strides = [1, 1]} : vector<16x32xf32> to vector<16x30xf32>
    %142 = tpu.concatenate %140, %141 in 1 : vector<16x2xf32>, vector<16x30xf32> -> vector<16x32xf32>
    %143 = arith.select %17, %142, %139 : vector<16x32xi1>, vector<16x32xf32>
    %144 = vector.extract_strided_slice %143 {offsets = [0, 28], sizes = [16, 4], strides = [1, 1]} : vector<16x32xf32> to vector<16x4xf32>
    %145 = vector.extract_strided_slice %143 {offsets = [0, 0], sizes = [16, 28], strides = [1, 1]} : vector<16x32xf32> to vector<16x28xf32>
    %146 = tpu.concatenate %144, %145 in 1 : vector<16x4xf32>, vector<16x28xf32> -> vector<16x32xf32>
    %147 = arith.select %23, %146, %143 : vector<16x32xi1>, vector<16x32xf32>
    %148 = vector.extract_strided_slice %147 {offsets = [0, 24], sizes = [16, 8], strides = [1, 1]} : vector<16x32xf32> to vector<16x8xf32>
    %149 = vector.extract_strided_slice %147 {offsets = [0, 0], sizes = [16, 24], strides = [1, 1]} : vector<16x32xf32> to vector<16x24xf32>
    %150 = tpu.concatenate %148, %149 in 1 : vector<16x8xf32>, vector<16x24xf32> -> vector<16x32xf32>
    %151 = arith.select %29, %150, %147 : vector<16x32xi1>, vector<16x32xf32>
    %cst_35 = arith.constant dense<0.000000e+00> : vector<16x8xf32>
    %152 = tpu.matmul %151, %102, %cst_35 {dimension_numbers = #tpu.dot_dimension_numbers<[1], [0], [0], [1], [0, 0, 1, 1], [], []>} : vector<16x32xf32>, vector<32x8xf32>, vector<16x8xf32> -> vector<16x8xf32>
    %153 = arith.addf %133, %152 : vector<16x8xf32>
    %154 = vector.extract_strided_slice %33 {offsets = [0, 16], sizes = [16, 8], strides = [1, 1]} : vector<16x32xf32> to vector<16x8xf32>
    %155 = vector.extract_strided_slice %35 {offsets = [0, 16], sizes = [16, 8], strides = [1, 1]} : vector<16x32xf32> to vector<16x8xf32>
    %156 = vector.extract_strided_slice %37 {offsets = [0, 16], sizes = [16, 8], strides = [1, 1]} : vector<16x32xf32> to vector<16x8xf32>
    %c2 = arith.constant 2 : index
    %c0_36 = arith.constant 0 : index
    %c0_37 = arith.constant 0 : index
    %157 = vector.load %arg5[%c2, %c0_36, %c0_37] : memref<4x32x8xf32, #tpu.memory_space<vmem>>, vector<1x32x8xf32>
    %158 = vector.shape_cast %157 : vector<1x32x8xf32> to vector<32x8xf32>
    %c2_38 = arith.constant 2 : index
    %c0_39 = arith.constant 0 : index
    %c0_40 = arith.constant 0 : index
    %159 = vector.load %arg6[%c2_38, %c0_39, %c0_40] : memref<4x32x8xf32, #tpu.memory_space<vmem>>, vector<1x32x8xf32>
    %160 = vector.shape_cast %159 : vector<1x32x8xf32> to vector<32x8xf32>
    %cst_41 = arith.constant dense<0.000000e+00> : vector<16x16xf32>
    %161 = tpu.matmul %154, %155, %cst_41 {dimension_numbers = #tpu.dot_dimension_numbers<[1], [1], [0], [0], [0, 0, 1, 0], [], []>} : vector<16x8xf32>, vector<16x8xf32>, vector<16x16xf32> -> vector<16x16xf32>
    %cst_42 = arith.constant dense<0.000000e+00> : vector<16x32xf32>
    %162 = tpu.matmul %154, %158, %cst_42 {dimension_numbers = #tpu.dot_dimension_numbers<[1], [1], [0], [0], [0, 0, 1, 0], [], []>} : vector<16x8xf32>, vector<32x8xf32>, vector<16x32xf32> -> vector<16x32xf32>
    %163 = vector.extract_strided_slice %162 {offsets = [0, 1], sizes = [16, 31], strides = [1, 1]} : vector<16x32xf32> to vector<16x31xf32>
    %164 = vector.extract_strided_slice %162 {offsets = [0, 0], sizes = [16, 1], strides = [1, 1]} : vector<16x32xf32> to vector<16x1xf32>
    %165 = tpu.concatenate %163, %164 in 1 : vector<16x31xf32>, vector<16x1xf32> -> vector<16x32xf32>
    %166 = arith.select %11, %165, %162 : vector<16x32xi1>, vector<16x32xf32>
    %167 = vector.extract_strided_slice %166 {offsets = [0, 2], sizes = [16, 30], strides = [1, 1]} : vector<16x32xf32> to vector<16x30xf32>
    %168 = vector.extract_strided_slice %166 {offsets = [0, 0], sizes = [16, 2], strides = [1, 1]} : vector<16x32xf32> to vector<16x2xf32>
    %169 = tpu.concatenate %167, %168 in 1 : vector<16x30xf32>, vector<16x2xf32> -> vector<16x32xf32>
    %170 = arith.select %17, %169, %166 : vector<16x32xi1>, vector<16x32xf32>
    %171 = vector.extract_strided_slice %170 {offsets = [0, 4], sizes = [16, 28], strides = [1, 1]} : vector<16x32xf32> to vector<16x28xf32>
    %172 = vector.extract_strided_slice %170 {offsets = [0, 0], sizes = [16, 4], strides = [1, 1]} : vector<16x32xf32> to vector<16x4xf32>
    %173 = tpu.concatenate %171, %172 in 1 : vector<16x28xf32>, vector<16x4xf32> -> vector<16x32xf32>
    %174 = arith.select %23, %173, %170 : vector<16x32xi1>, vector<16x32xf32>
    %175 = vector.extract_strided_slice %174 {offsets = [0, 8], sizes = [16, 24], strides = [1, 1]} : vector<16x32xf32> to vector<16x24xf32>
    %176 = vector.extract_strided_slice %174 {offsets = [0, 0], sizes = [16, 8], strides = [1, 1]} : vector<16x32xf32> to vector<16x8xf32>
    %177 = tpu.concatenate %175, %176 in 1 : vector<16x24xf32>, vector<16x8xf32> -> vector<16x32xf32>
    %178 = arith.select %29, %177, %174 : vector<16x32xi1>, vector<16x32xf32>
    %179 = vector.extract_strided_slice %178 {offsets = [0, 0], sizes = [16, 16], strides = [1, 1]} : vector<16x32xf32> to vector<16x16xf32>
    %180 = arith.addf %161, %179 : vector<16x16xf32>
    %cst_43 = arith.constant dense<0xFF800000> : vector<16xf32>
    %181 = vector.multi_reduction <maximumf>, %180, %cst_43 [1] : vector<16x16xf32> to vector<16xf32>
    %182 = vector.shape_cast %181 : vector<16xf32> to vector<16x1xf32>
    %183 = vector.broadcast %182 : vector<16x1xf32> to vector<16x16xf32>
    %184 = arith.subf %180, %183 : vector<16x16xf32>
    %185 = math.exp %184 : vector<16x16xf32>
    %cst_44 = arith.constant dense<0.000000e+00> : vector<16xf32>
    %186 = vector.multi_reduction <add>, %185, %cst_44 [1] : vector<16x16xf32> to vector<16xf32>
    %187 = vector.shape_cast %186 : vector<16xf32> to vector<16x1xf32>
    %188 = tpu.reciprocal %187 {approx = true} : vector<16x1xf32> -> vector<16x1xf32>
    %189 = vector.broadcast %188 : vector<16x1xf32> to vector<16x16xf32>
    %190 = arith.mulf %185, %189 : vector<16x16xf32>
    %cst_45 = arith.constant dense<0.000000e+00> : vector<16x8xf32>
    %191 = tpu.matmul %190, %156, %cst_45 {dimension_numbers = #tpu.dot_dimension_numbers<[1], [0], [0], [1], [0, 0, 1, 1], [], []>} : vector<16x16xf32>, vector<16x8xf32>, vector<16x8xf32> -> vector<16x8xf32>
    %cst_46 = arith.constant 0.000000e+00 : f32
    %192 = vector.broadcast %cst_46 : f32 to vector<16x16xf32>
    %193 = tpu.concatenate %190, %192 in 1 : vector<16x16xf32>, vector<16x16xf32> -> vector<16x32xf32>
    %194 = vector.extract_strided_slice %193 {offsets = [0, 31], sizes = [16, 1], strides = [1, 1]} : vector<16x32xf32> to vector<16x1xf32>
    %195 = vector.extract_strided_slice %193 {offsets = [0, 0], sizes = [16, 31], strides = [1, 1]} : vector<16x32xf32> to vector<16x31xf32>
    %196 = tpu.concatenate %194, %195 in 1 : vector<16x1xf32>, vector<16x31xf32> -> vector<16x32xf32>
    %197 = arith.select %11, %196, %193 : vector<16x32xi1>, vector<16x32xf32>
    %198 = vector.extract_strided_slice %197 {offsets = [0, 30], sizes = [16, 2], strides = [1, 1]} : vector<16x32xf32> to vector<16x2xf32>
    %199 = vector.extract_strided_slice %197 {offsets = [0, 0], sizes = [16, 30], strides = [1, 1]} : vector<16x32xf32> to vector<16x30xf32>
    %200 = tpu.concatenate %198, %199 in 1 : vector<16x2xf32>, vector<16x30xf32> -> vector<16x32xf32>
    %201 = arith.select %17, %200, %197 : vector<16x32xi1>, vector<16x32xf32>
    %202 = vector.extract_strided_slice %201 {offsets = [0, 28], sizes = [16, 4], strides = [1, 1]} : vector<16x32xf32> to vector<16x4xf32>
    %203 = vector.extract_strided_slice %201 {offsets = [0, 0], sizes = [16, 28], strides = [1, 1]} : vector<16x32xf32> to vector<16x28xf32>
    %204 = tpu.concatenate %202, %203 in 1 : vector<16x4xf32>, vector<16x28xf32> -> vector<16x32xf32>
    %205 = arith.select %23, %204, %201 : vector<16x32xi1>, vector<16x32xf32>
    %206 = vector.extract_strided_slice %205 {offsets = [0, 24], sizes = [16, 8], strides = [1, 1]} : vector<16x32xf32> to vector<16x8xf32>
    %207 = vector.extract_strided_slice %205 {offsets = [0, 0], sizes = [16, 24], strides = [1, 1]} : vector<16x32xf32> to vector<16x24xf32>
    %208 = tpu.concatenate %206, %207 in 1 : vector<16x8xf32>, vector<16x24xf32> -> vector<16x32xf32>
    %209 = arith.select %29, %208, %205 : vector<16x32xi1>, vector<16x32xf32>
    %cst_47 = arith.constant dense<0.000000e+00> : vector<16x8xf32>
    %210 = tpu.matmul %209, %160, %cst_47 {dimension_numbers = #tpu.dot_dimension_numbers<[1], [0], [0], [1], [0, 0, 1, 1], [], []>} : vector<16x32xf32>, vector<32x8xf32>, vector<16x8xf32> -> vector<16x8xf32>
    %211 = arith.addf %191, %210 : vector<16x8xf32>
    %212 = vector.extract_strided_slice %33 {offsets = [0, 24], sizes = [16, 8], strides = [1, 1]} : vector<16x32xf32> to vector<16x8xf32>
    %213 = vector.extract_strided_slice %35 {offsets = [0, 24], sizes = [16, 8], strides = [1, 1]} : vector<16x32xf32> to vector<16x8xf32>
    %214 = vector.extract_strided_slice %37 {offsets = [0, 24], sizes = [16, 8], strides = [1, 1]} : vector<16x32xf32> to vector<16x8xf32>
    %c3 = arith.constant 3 : index
    %c0_48 = arith.constant 0 : index
    %c0_49 = arith.constant 0 : index
    %215 = vector.load %arg5[%c3, %c0_48, %c0_49] : memref<4x32x8xf32, #tpu.memory_space<vmem>>, vector<1x32x8xf32>
    %216 = vector.shape_cast %215 : vector<1x32x8xf32> to vector<32x8xf32>
    %c3_50 = arith.constant 3 : index
    %c0_51 = arith.constant 0 : index
    %c0_52 = arith.constant 0 : index
    %217 = vector.load %arg6[%c3_50, %c0_51, %c0_52] : memref<4x32x8xf32, #tpu.memory_space<vmem>>, vector<1x32x8xf32>
    %218 = vector.shape_cast %217 : vector<1x32x8xf32> to vector<32x8xf32>
    %cst_53 = arith.constant dense<0.000000e+00> : vector<16x16xf32>
    %219 = tpu.matmul %212, %213, %cst_53 {dimension_numbers = #tpu.dot_dimension_numbers<[1], [1], [0], [0], [0, 0, 1, 0], [], []>} : vector<16x8xf32>, vector<16x8xf32>, vector<16x16xf32> -> vector<16x16xf32>
    %cst_54 = arith.constant dense<0.000000e+00> : vector<16x32xf32>
    %220 = tpu.matmul %212, %216, %cst_54 {dimension_numbers = #tpu.dot_dimension_numbers<[1], [1], [0], [0], [0, 0, 1, 0], [], []>} : vector<16x8xf32>, vector<32x8xf32>, vector<16x32xf32> -> vector<16x32xf32>
    %221 = vector.extract_strided_slice %220 {offsets = [0, 1], sizes = [16, 31], strides = [1, 1]} : vector<16x32xf32> to vector<16x31xf32>
    %222 = vector.extract_strided_slice %220 {offsets = [0, 0], sizes = [16, 1], strides = [1, 1]} : vector<16x32xf32> to vector<16x1xf32>
    %223 = tpu.concatenate %221, %222 in 1 : vector<16x31xf32>, vector<16x1xf32> -> vector<16x32xf32>
    %224 = arith.select %11, %223, %220 : vector<16x32xi1>, vector<16x32xf32>
    %225 = vector.extract_strided_slice %224 {offsets = [0, 2], sizes = [16, 30], strides = [1, 1]} : vector<16x32xf32> to vector<16x30xf32>
    %226 = vector.extract_strided_slice %224 {offsets = [0, 0], sizes = [16, 2], strides = [1, 1]} : vector<16x32xf32> to vector<16x2xf32>
    %227 = tpu.concatenate %225, %226 in 1 : vector<16x30xf32>, vector<16x2xf32> -> vector<16x32xf32>
    %228 = arith.select %17, %227, %224 : vector<16x32xi1>, vector<16x32xf32>
    %229 = vector.extract_strided_slice %228 {offsets = [0, 4], sizes = [16, 28], strides = [1, 1]} : vector<16x32xf32> to vector<16x28xf32>
    %230 = vector.extract_strided_slice %228 {offsets = [0, 0], sizes = [16, 4], strides = [1, 1]} : vector<16x32xf32> to vector<16x4xf32>
    %231 = tpu.concatenate %229, %230 in 1 : vector<16x28xf32>, vector<16x4xf32> -> vector<16x32xf32>
    %232 = arith.select %23, %231, %228 : vector<16x32xi1>, vector<16x32xf32>
    %233 = vector.extract_strided_slice %232 {offsets = [0, 8], sizes = [16, 24], strides = [1, 1]} : vector<16x32xf32> to vector<16x24xf32>
    %234 = vector.extract_strided_slice %232 {offsets = [0, 0], sizes = [16, 8], strides = [1, 1]} : vector<16x32xf32> to vector<16x8xf32>
    %235 = tpu.concatenate %233, %234 in 1 : vector<16x24xf32>, vector<16x8xf32> -> vector<16x32xf32>
    %236 = arith.select %29, %235, %232 : vector<16x32xi1>, vector<16x32xf32>
    %237 = vector.extract_strided_slice %236 {offsets = [0, 0], sizes = [16, 16], strides = [1, 1]} : vector<16x32xf32> to vector<16x16xf32>
    %238 = arith.addf %219, %237 : vector<16x16xf32>
    %cst_55 = arith.constant dense<0xFF800000> : vector<16xf32>
    %239 = vector.multi_reduction <maximumf>, %238, %cst_55 [1] : vector<16x16xf32> to vector<16xf32>
    %240 = vector.shape_cast %239 : vector<16xf32> to vector<16x1xf32>
    %241 = vector.broadcast %240 : vector<16x1xf32> to vector<16x16xf32>
    %242 = arith.subf %238, %241 : vector<16x16xf32>
    %243 = math.exp %242 : vector<16x16xf32>
    %cst_56 = arith.constant dense<0.000000e+00> : vector<16xf32>
    %244 = vector.multi_reduction <add>, %243, %cst_56 [1] : vector<16x16xf32> to vector<16xf32>
    %245 = vector.shape_cast %244 : vector<16xf32> to vector<16x1xf32>
    %246 = tpu.reciprocal %245 {approx = true} : vector<16x1xf32> -> vector<16x1xf32>
    %247 = vector.broadcast %246 : vector<16x1xf32> to vector<16x16xf32>
    %248 = arith.mulf %243, %247 : vector<16x16xf32>
    %cst_57 = arith.constant dense<0.000000e+00> : vector<16x8xf32>
    %249 = tpu.matmul %248, %214, %cst_57 {dimension_numbers = #tpu.dot_dimension_numbers<[1], [0], [0], [1], [0, 0, 1, 1], [], []>} : vector<16x16xf32>, vector<16x8xf32>, vector<16x8xf32> -> vector<16x8xf32>
    %cst_58 = arith.constant 0.000000e+00 : f32
    %250 = vector.broadcast %cst_58 : f32 to vector<16x16xf32>
    %251 = tpu.concatenate %248, %250 in 1 : vector<16x16xf32>, vector<16x16xf32> -> vector<16x32xf32>
    %252 = vector.extract_strided_slice %251 {offsets = [0, 31], sizes = [16, 1], strides = [1, 1]} : vector<16x32xf32> to vector<16x1xf32>
    %253 = vector.extract_strided_slice %251 {offsets = [0, 0], sizes = [16, 31], strides = [1, 1]} : vector<16x32xf32> to vector<16x31xf32>
    %254 = tpu.concatenate %252, %253 in 1 : vector<16x1xf32>, vector<16x31xf32> -> vector<16x32xf32>
    %255 = arith.select %11, %254, %251 : vector<16x32xi1>, vector<16x32xf32>
    %256 = vector.extract_strided_slice %255 {offsets = [0, 30], sizes = [16, 2], strides = [1, 1]} : vector<16x32xf32> to vector<16x2xf32>
    %257 = vector.extract_strided_slice %255 {offsets = [0, 0], sizes = [16, 30], strides = [1, 1]} : vector<16x32xf32> to vector<16x30xf32>
    %258 = tpu.concatenate %256, %257 in 1 : vector<16x2xf32>, vector<16x30xf32> -> vector<16x32xf32>
    %259 = arith.select %17, %258, %255 : vector<16x32xi1>, vector<16x32xf32>
    %260 = vector.extract_strided_slice %259 {offsets = [0, 28], sizes = [16, 4], strides = [1, 1]} : vector<16x32xf32> to vector<16x4xf32>
    %261 = vector.extract_strided_slice %259 {offsets = [0, 0], sizes = [16, 28], strides = [1, 1]} : vector<16x32xf32> to vector<16x28xf32>
    %262 = tpu.concatenate %260, %261 in 1 : vector<16x4xf32>, vector<16x28xf32> -> vector<16x32xf32>
    %263 = arith.select %23, %262, %259 : vector<16x32xi1>, vector<16x32xf32>
    %264 = vector.extract_strided_slice %263 {offsets = [0, 24], sizes = [16, 8], strides = [1, 1]} : vector<16x32xf32> to vector<16x8xf32>
    %265 = vector.extract_strided_slice %263 {offsets = [0, 0], sizes = [16, 24], strides = [1, 1]} : vector<16x32xf32> to vector<16x24xf32>
    %266 = tpu.concatenate %264, %265 in 1 : vector<16x8xf32>, vector<16x24xf32> -> vector<16x32xf32>
    %267 = arith.select %29, %266, %263 : vector<16x32xi1>, vector<16x32xf32>
    %cst_59 = arith.constant dense<0.000000e+00> : vector<16x8xf32>
    %268 = tpu.matmul %267, %218, %cst_59 {dimension_numbers = #tpu.dot_dimension_numbers<[1], [0], [0], [1], [0, 0, 1, 1], [], []>} : vector<16x32xf32>, vector<32x8xf32>, vector<16x8xf32> -> vector<16x8xf32>
    %269 = arith.addf %249, %268 : vector<16x8xf32>
    %270 = tpu.concatenate %95, %153, %211, %269 in 1 : vector<16x8xf32>, vector<16x8xf32>, vector<16x8xf32>, vector<16x8xf32> -> vector<16x32xf32>
    %c0_60 = arith.constant 0 : index
    %c0_61 = arith.constant 0 : index
    %271 = vector.load %arg7[%c0_60, %c0_61] : memref<32x32xf32, #tpu.memory_space<vmem>>, vector<32x32xf32>
    %cst_62 = arith.constant dense<0.000000e+00> : vector<16x32xf32>
    %272 = tpu.matmul %270, %271, %cst_62 {dimension_numbers = #tpu.dot_dimension_numbers<[1], [0], [0], [1], [0, 0, 1, 1], [], []>} : vector<16x32xf32>, vector<32x32xf32>, vector<16x32xf32> -> vector<16x32xf32>
    %c0_63 = arith.constant 0 : index
    %c0_64 = arith.constant 0 : index
    %273 = vector.load %arg8[%c0_63, %c0_64] : memref<1x32xf32, #tpu.memory_space<vmem>>, vector<1x32xf32>
    %274 = vector.broadcast %273 : vector<1x32xf32> to vector<16x32xf32>
    %275 = arith.addf %272, %274 : vector<16x32xf32>
    %c0_65 = arith.constant 0 : index
    %c0_66 = arith.constant 0 : index
    %c0_67 = arith.constant 0 : index
    %276 = vector.load %arg9[%c0_65, %c0_66, %c0_67] : memref<1x16x32xf32, #tpu.memory_space<vmem>>, vector<1x16x32xf32>
    %277 = vector.shape_cast %276 : vector<1x16x32xf32> to vector<16x32xf32>
    %278 = vector.shape_cast %275 : vector<16x32xf32> to vector<1x16x32xf32>
    tpu.vector_store %arg9[%c0_65, %c0_66, %c0_67], %278 {strides = array<i32>} : memref<1x16x32xf32, #tpu.memory_space<vmem>>, vector<1x16x32xf32>,
    return
  }
  func.func @transform_0(%arg0: i32, %arg1: i32) -> (i32, i32, i32) {
    %c0_i32 = arith.constant 0 : i32
    %c0_i32_0 = arith.constant 0 : i32
    return %arg0, %arg1, %c0_i32 : i32, i32, i32
  }
  func.func @transform_1(%arg0: i32, %arg1: i32) -> (i32, i32, i32) {
    %c0_i32 = arith.constant 0 : i32
    %c0_i32_0 = arith.constant 0 : i32
    %c0_i32_1 = arith.constant 0 : i32
    return %arg0, %c0_i32, %c0_i32_0 : i32, i32, i32
  }
  func.func @transform_2(%arg0: i32, %arg1: i32) -> (i32, i32, i32) {
    %c0_i32 = arith.constant 0 : i32
    %c0_i32_0 = arith.constant 0 : i32
    %c0_i32_1 = arith.constant 0 : i32
    return %arg0, %c0_i32, %c0_i32_0 : i32, i32, i32
  }
  func.func @transform_3(%arg0: i32, %arg1: i32) -> (i32, i32, i32) {
    %c0_i32 = arith.constant 0 : i32
    %c0_i32_0 = arith.constant 0 : i32
    %c0_i32_1 = arith.constant 0 : i32
    %c0_i32_2 = arith.constant 0 : i32
    return %c0_i32, %c0_i32_0, %c0_i32_1 : i32, i32, i32
  }
  func.func @transform_4(%arg0: i32, %arg1: i32) -> (i32, i32, i32) {
    %c0_i32 = arith.constant 0 : i32
    %c0_i32_0 = arith.constant 0 : i32
    %c0_i32_1 = arith.constant 0 : i32
    %c0_i32_2 = arith.constant 0 : i32
    return %c0_i32, %c0_i32_0, %c0_i32_1 : i32, i32, i32
  }
  func.func @transform_5(%arg0: i32, %arg1: i32) -> (i32, i32) {
    %c0_i32 = arith.constant 0 : i32
    %c0_i32_0 = arith.constant 0 : i32
    %c0_i32_1 = arith.constant 0 : i32
    return %c0_i32, %c0_i32_0 : i32, i32
  }
  func.func @transform_6(%arg0: i32, %arg1: i32) -> (i32, i32) {
    %c0_i32 = arith.constant 0 : i32
    %c0_i32_0 = arith.constant 0 : i32
    %c0_i32_1 = arith.constant 0 : i32
    return %c0_i32, %c0_i32_0 : i32, i32
  }
  func.func @transform_7(%arg0: i32, %arg1: i32) -> (i32, i32, i32) {
    %c0_i32 = arith.constant 0 : i32
    %c0_i32_0 = arith.constant 0 : i32
    return %arg0, %arg1, %c0_i32 : i32, i32, i32
  }
}

</mosaic_0001>

<bundles_post_ra>
// kernel: _forward.2
= control target key start
LH: loop header
LB: loop body
LE: loop exit
PB: predicated region body
PF: predicated region fallthrough
CT: control target
= control target key end

     0   :  { %8 = vsyncpa [#allocation3], 0  ;;  %s294_s0 = inlined_call_operand.hbm [shape: f32[32,32], index: 0, kind: input, shape index: {}]   ;;  %s295_s1 = inlined_call_operand.hbm [shape: f32[32,96], index: 1, kind: input, shape index: {}]   ;;  %s296_s2 = inlined_call_operand.vmem [shape: f32[1,96], index: 2, kind: input, shape index: {}]   ;;  %s297_s3 = inlined_call_operand.vmem [shape: f32[32,96], index: 3, kind: output, shape index: {}]  }
   0x1   :  { %9 = vsyncpa [#allocation5], 0  ;;  %s249_s12 = smov [#allocation2]  }
   0x2   :  { %s15_s13 = sshll.u32 %s249_s12, 4  ;;  %s16_s13 = int_to_ptr.vmem [resolvable:$true] %s15_s13 }
   0x3   :  { %s213_s14 = scalar_lea.vmem %s16_s13, 512  ;;  %p218_p1 = scmp.lt.s32.totalorder %s16_s13, %s16_s13 }
   0x4   :  { %p214_p0 = scmp.ne.s32.totalorder %s16_s13, %s213_s14  ;;  %p219_p2 = scmp.lt.s32.totalorder %s213_s14, %s213_s14 }
   0x6   :  { %p220_p3 = por %p219_p2, %p218_p1 }
   0x8   :  { %p221_p4 = pnand %p220_p3, %p214_p0 }
   0xa   :  { %224 = shalt.err (!%p221_p4)
}
   0xb   :  { %s250_s15 = smov 128   ;;  %s251_s16 = smov 8  }
   0xc   :  { %21 = dma.hbm_to_vmem [thread:$0]  %s294_s0, 512, %s16_s13, [#allocation3], %s250_s15, %s250_s15, %s251_s16  }
   0xd   :  { %s252_s19 = smov [#allocation4]  }
   0xe   :  { %s27_s20 = sshll.u32 %s252_s19, 4  ;;  %s28_s20 = int_to_ptr.vmem [resolvable:$true] %s27_s20 }
   0xf   :  { %s233_s21 = scalar_lea.vmem %s28_s20, 512  ;;  %p238_p6 = scmp.lt.s32.totalorder %s28_s20, %s28_s20 }
  0x10   :  { %p234_p5 = scmp.ne.s32.totalorder %s28_s20, %s233_s21  ;;  %p239_p7 = scmp.lt.s32.totalorder %s233_s21, %s233_s21 }
  0x12   :  { %p240_p8 = por %p239_p7, %p238_p6 }
  0x14   :  { %p241_p9 = pnand %p240_p8, %p234_p5 }
  0x16   :  { %244 = shalt.err (!%p241_p9)
}
  0x17   :  { %33 = dma.hbm_to_vmem [thread:$0]  %s295_s1, 512, %s28_s20, [#allocation5], %s250_s15, %s250_s15, %s251_s16  }
  0x18   :  { %245 = dma.done.wait [#allocation3], 512  }
  0x19   :  { %246 = vsyncadd [#allocation3], 4294966784 }
  0x1a   :  { %247 = dma.done.wait [#allocation5], 512  }
  0x1b   :  { %248 = vsyncadd [#allocation5], 4294966784  ;;  %v49_v0 = vld [vmem:[#allocation4 + $0x18] sm:$0xff]  ;;  %v48_v1 = vld [vmem:[#allocation4 + $0x10] sm:$0xff]  ;;  %vm57_vm0 = vcmask 261120   ;;  %vm155_vm1 = vcmask 785408  }
  0x1c   :  { %179 = vmatprep.subr.mxu0 %v49_v0  ;;  %193 = vmatprep.subr.mxu1 %v49_v0  ;;  %v47_v2 = vld [vmem:[#allocation4 + $0x8] sm:$0xff]  ;;  %v46_v3 = vld [vmem:[#allocation4] sm:$0xff]  ;;  %v44_v5 = vld [vmem:[#allocation2 + $0x10] sm:$0xff] }
  0x1d   :  { %180 = vmatpush3.msra.mxu0 %v49_v0  ;;  %197 = vmatpush3.msra.mxu1 %v49_v0  ;;  %v42_v4 = vld [vmem:[#allocation2] sm:$0xff]  ;;  %v43_v6 = vld [vmem:[#allocation2 + $0x8] sm:$0xff]  ;;  %v45_v7 = vld [vmem:[#allocation2 + $0x18] sm:$0xff] }
  0x1e   :  { %181 = vmatprep.subr.mxu0 %v48_v1  ;;  %194 = vmatprep.subr.mxu1 %v48_v1  ;;  %v166_v8 = vld [vmem:[%s296_s2] ss:$0 sm:$0xff] }
  0x1f   :  { %182 = vmatpush3.msra.mxu0 %v48_v1  ;;  %198 = vmatpush3.msra.mxu1 %v48_v1 }
  0x20   :  { %183 = vmatprep.subr.mxu0 %v47_v2  ;;  %195 = vmatprep.subr.mxu1 %v47_v2 }
  0x21   :  { %184 = vmatpush3.msra.mxu0 %v47_v2  ;;  %199 = vmatpush3.msra.mxu1 %v47_v2 }
  0x22   :  { %185 = vmatprep.subr.mxu0 %v46_v3  ;;  %196 = vmatprep.subr.mxu1 %v46_v3 }
  0x23   :  { %186 = vmatpush3.msra.mxu0 %v46_v3  ;;  %200 = vmatpush3.msra.mxu1 %v46_v3 }
  0x24   :  { %187 = vmatprep.mubr.msk.f32.mxu0 %vm57_vm0, %v42_v4  ;;  %190 = vmatprep.mubr.msk.f32.mxu1 %vm57_vm0, %v44_v5 }
  0x25   :  { %188 = vmatmul.mubr.msk.f32.vlgmr.msra.gmra.mxu0 %vm57_vm0, %v43_v6  ;;  %191 = vmatmul.mubr.msk.f32.vlgmr.msra.gmra.mxu1 %vm57_vm0, %v45_v7 }
  0xe5   :  { %v189_v9 = vpop.f32.mrf.mxu0  ;;  %v192_v10 = vpop.f32.mrf.mxu1 }
  0xe6   :  { %v142_v11 = vadd.f32 %v189_v9, %v166_v8  ;;  %v152_v12 = vadd.f32 %v192_v10, %v166_v8 }
  0xe7   :  { %v136_v13 = vpop.f32.mrf.mxu0  ;;  %v146_v14 = vpop.f32.mrf.mxu1 }
  0xe8   :  { %157 = vst.msk [vmem:[%s297_s3 + $0x8] sm:$0xff] %vm155_vm1, %v142_v11  ;;  %159 = vst.msk [vmem:[%s297_s3 + $0x18] sm:$0xff] %vm155_vm1, %v152_v12  ;;  %v137_v15 = vadd.f32 %v166_v8, %v136_v13  ;;  %v147_v16 = vadd.f32 %v166_v8, %v146_v14 }
  0xea   :  { %156 = vst.msk [vmem:[%s297_s3] sm:$0xff] %vm155_vm1, %v137_v15  ;;  %158 = vst.msk [vmem:[%s297_s3 + $0x10] sm:$0xff] %vm155_vm1, %v147_v16 }
  0xeb   :  { %164 = vsyncpa [#allocation3], 1 }
  0xec   :  { %165 = vsyncpa [#allocation5], 1 }

// kernel: _forward.3
= control target key start
LH: loop header
LB: loop body
LE: loop exit
PB: predicated region body
PF: predicated region fallthrough
CT: control target
= control target key end

     0   :  { %s4072_s0 = inlined_call_operand.vmem [shape: f32[2,16,32], index: 0, kind: input, shape index: {}]   ;;  %s4073_s1 = inlined_call_operand.vmem [shape: f32[2,16,32], index: 1, kind: input, shape index: {}]   ;;  %s4074_s2 = inlined_call_operand.vmem [shape: f32[2,16,32], index: 2, kind: input, shape index: {}]   ;;  %s4075_s3 = inlined_call_operand.vmem [shape: f32[4,32,8], index: 3, kind: input, shape index: {}]   ;;  %s4076_s4 = inlined_call_operand.vmem [shape: f32[4,32,8], index: 4, kind: input, shape index: {}]   ;;  %s4077_s5 = inlined_call_operand.vmem [shape: f32[32,32], index: 5, kind: input, shape index: {}]   ;;  %s4078_s6 = inlined_call_operand.vmem [shape: f32[1,32], index: 6, kind: input, shape index: {}]   ;;  %s4079_s7 = inlined_call_operand.hbm [shape: f32[2,16,32], index: 7, kind: output, shape index: {}]  }
   0x1   :  { %4122 = sst [smem:[#allocation13_spill]] %s4072_s0 }
   0x2   :  { %4123 = sst [smem:[#allocation14_spill]] %s4073_s1 }
   0x3   :  { %4124 = sst [smem:[#allocation15_spill]] %s4074_s2 }
   0x4   :  { %4125 = sst [smem:[#allocation16_spill]] %s4079_s7 }
   0x5   :  { %12 = vsyncpa [#allocation3], 0 }
   0x6   :  { %14 = vsyncpa [#allocation3 + $0x1], 0  ;;  %s3327_s24 = smov 0   ;;  %s3329_s25 = smov 0  }
   0x7   :  { %s3331_s26 = smov 0   ;;  %s3333_s27 = smov 0  }
   0x8   :  { %s3335_s28 = smov 0   ;;  %s3337_s29 = smov 0  }
   0x9 LB: > { %4126 = sst [smem:[#allocation5_spill]] %s3245_s24  ;;  %s2736_s30 = sadd.s32 4294967295, %s3265_s29   ;;  %s3265_s29 = sphi %s3337_s29, %s20_s29   ;;  %s3261_s28 = sphi %s3335_s28, %s4175_s28   ;;  %s3257_s27 = sphi %s3333_s27, %s4174_s27   ;;  %s3253_s26 = sphi %s3331_s26, %s4173_s26   ;;  %s3249_s25 = sphi %s3329_s25, %s4177_s25   ;;  %s3245_s24 = sphi %s3327_s24, %s4176_s24  }
   0xa   : > { %4127 = sst [smem:[#allocation6_spill]] %s3253_s26  ;;  %s2737_s8 = sadd.s32 4294967294, %s3265_s29  }
   0xb   : > { %4128 = sst [smem:[#allocation7_spill]] %s3261_s28  ;;  %s32_s9 = sadd.s32 1, %s3261_s28 }
   0xc   : > { %4129 = sst [smem:[#allocation8_spill]] %s3265_s29  ;;  %s205_s10 = sadd.s32 1, %s3253_s26 }
   0xd   : > { %p34_p0 = scmp.ge.s32.totalorder %s32_s9, 2  ;;  %p215_p1 = scmp.ne.s32.totalorder %s3253_s26, %s3249_s25 }
   0xe   : > { %p216_p2 = scmp.eq.s32.totalorder %s2736_s30, 1  ;;  %p221_p3 = scmp.ne.s32.totalorder %s3249_s25, %s3245_s24 }
   0xf   : > { %s4179_s9 = smov (%p34_p0, %s32_s9), 0  ;;  %p222_p5 = scmp.eq.s32.totalorder %s2737_s8, 1 }
  0x10   : > { %4130 = sst [smem:[#allocation9_spill]] %s4179_s9  ;;  %p3367_p4 = por %p216_p2, %p215_p1 }
  0x11   : > { %s200_s12 = ssub.s32 %s3261_s28, %s4179_s9  ;;  %p2740_p6 = scmp.ge.s32.totalorder %s3265_s29, 1 }
  0x12   : > { %s4131_s11 = scalar_select %p3367_p4, 1, 0 }
  0x13   : > { %p203_p7 = scmp.eq.s32.totalorder %s200_s12, 0  ;;  %p3374_p8 = por %p222_p5, %p221_p3 }
  0x14   : > { %4132 = sst [smem:[#allocation10_spill]] %s4131_s11  ;;  %p281_p9 = scmp.lt.s32.totalorder %s3265_s29, 3 }
  0x15   : > { %s4133_s13 = scalar_select %p3374_p8, 1, 0 }
  0x16   : > { %s3380_s14 = scalar_select %p203_p7, %s3253_s26, %s205_s10  }
  0x17   : > { %4134 = sst [smem:[#allocation11_spill]] %s4133_s13  ;;  %p282_p10 = pnand %p2740_p6, %p281_p9 }
  0x18   : > { %4135 = sst [smem:[#allocation12_spill]] %s3380_s14  ;;  %p328_p11 = scmp.lt.s32.totalorder (!%p282_p10), %s3257_s27, 1 }
  0x19   : > { %285 = sbr.rel (%p282_p10) target bundleno = 6416 (0x1910), region = 48  ;;  %s4136_s0 = sld [smem:[#allocation13_spill]] (!%p282_p10) }
  0x1a   : > { %s4100_s15 = smov (!%p282_p10), 127   ;;  %s4102_s16 = smov (!%p282_p10), 31  }
  0x1b   : > { %s4139_s1 = sld [smem:[#allocation14_spill]] (!%p282_p10)  ;;  %s4096_s20 = smov (!%p282_p10), 126  }
  0x1c   : > { %s4098_s21 = smov (!%p282_p10), 30   ;;  %s4092_s23 = smov (!%p282_p10), 28  }
  0x1d   : > { %s4086_s30 = smov (!%p282_p10), 124   ;;  %s4104_s10 = smov (!%p282_p10), 120  }
  0x1e   : > { %v400_v0 = vld [vmem:[%s4075_s3 + $0x18] sm:$0xff]  ;;  %vm405_vm0 = vcmask 64512   ;;  %v399_v1 = vld [vmem:[%s4075_s3 + $0x10] sm:$0xff]  ;;  %s329_s19 = scalar_select %p328_p11, %s3257_s27, 1  ;;  %v398_v2 = vld [vmem:[%s4075_s3 + $0x8] sm:$0xff]  ;;  %v349_v10 = vlaneseq  ;;  %vm513_vm1 = vcmask 252928  }
  0x1f   : > { %2926 = vmatprep.subr.msk.mxu0 %vm405_vm0, %v400_v0  ;;  %v397_v5 = vld [vmem:[%s4075_s3] sm:$0xff]  ;;  %vm532_vm3 = vcmask 244736   ;;  %vm551_vm6 = vcmask 228352   ;;  %vm570_vm9 = vcmask 195584   ;;  %vm656_vm10 = vcmask 130048   ;;  %s4082_s12 = smov 1  }
  0x20   : > { %2927 = vmatpush3.xpose.msk.msra.mxu0 %vm405_vm0, %v400_v0  ;;  %s3396_s22 = sshll.u32 %s329_s19, 4  ;;  %v350_v11 = vshrl.u32 %v349_v10, 7  ;;  %s4080_s17 = smov 97   ;;  %vm695_vm12 = vcmask 7168   ;;  %vm714_vm13 = vcmask 15360   ;;  %vm733_vm14 = vcmask 31744  }
  0x21   : > { %2928 = vmatprep.subr.msk.mxu0 %vm405_vm0, %v399_v1  ;;  %s335_s8 = scalar_lea.vmem %s4136_s0, %s3396_s22  ;;  %s341_s19 = scalar_lea.vmem %s4139_s1, %s3396_s22  ;;  %vm756_vm15 = vcmask 261120   ;;  %v2813_v30 = vld [vmem:[%s4076_s4 + $0x78] sm:$0xff]  ;;  %v2524_v54 = vld [vmem:[%s4077_s5 + $0x8] sm:$0xff] }
  0x22   : > { %v389_v3 = vld [vmem:[%s335_s8] sm:$0xff]  ;;  %v390_v6 = vld [vmem:[%s335_s8 + $0x8] sm:$0xff]  ;;  %v355_v12 = vsub.s32 15, %v350_v11  ;;  %v351_v21 = vadd.s32 8, %v350_v11  ;;  %s4084_s8 = smov 24   ;;  %s4088_s18 = smov 2  }
  0x23   : > { %v3404_v4 = vmul.f32 0.35355338, %v389_v3  ;;  %v3415_v7 = vmul.f32 0.35355338, %v390_v6  ;;  %v3432_v18 = vld [vmem:[%s341_s19 + $0x8] sm:$0xff]  ;;  %v3434_v19 = vld [vmem:[%s341_s19] sm:$0xff] }
  0x24   : > { %2929 = vmatpush3.xpose.msk.msra.mxu0 %vm405_vm0, %v399_v1  ;;  %v357_v13 = vand.u32 1, %v355_v12  ;;  %2937 = vmatprep.subr.msk.mxu1 %vm405_vm0, %v3432_v18  ;;  %v365_v22 = vand.u32 2, %v355_v12  ;;  %v356_v23 = vsub.s32 15, %v351_v21  ;;  %v373_v35 = vand.u32 4, %v355_v12  ;;  %s4090_s19 = smov 98   ;;  %s4150_s2 = sld [smem:[#allocation15_spill]] }
  0x25   : > { %2930 = vmatprep.subr.msk.mxu0 %vm405_vm0, %v398_v2  ;;  %2934 = vmatprep.mubr.msk.f32.mxu0 %vm405_vm0, %v3404_v4  ;;  %s4158_s0 = smov 4   ;;  %s4159_s9 = smov 8  }
  0x26   : > { %2941 = vmatprep.mubr.msk.f32.mxu1 %vm405_vm0, %v3404_v4  ;;  %vm3423_vm2 = vcmp.ne.s32.totalorder %v357_v13, 0  ;;  %2938 = vmatpush3.xpose.msk.msra.mxu1 %vm405_vm0, %v3432_v18  ;;  %vm3451_vm4 = vcmp.ne.s32.totalorder %v365_v22, 0  ;;  %v358_v26 = vand.u32 1, %v356_v23  ;;  %vm3469_vm7 = vcmp.ne.s32.totalorder %v373_v35, 0  ;;  %v403_v35 = vld [vmem:[%s4076_s4 + $0x10] sm:$0xff]  ;;  %s4165_s1 = smov 126  }
  0x27   : > { %2939 = vmatprep.subr.msk.mxu1 %vm405_vm0, %v3434_v19  ;;  %v366_v37 = vand.u32 2, %v356_v23  ;;  %v374_v48 = vand.u32 4, %v356_v23  ;;  %s4166_s7 = smov 112  }
  0x28   : > { %2931 = vmatpush3.xpose.msk.msra.mxu0 %vm405_vm0, %v398_v2  ;;  %vm3460_vm5 = vcmp.ne.s32.totalorder %v358_v26, 0 }
  0x29   : > { %2932 = vmatprep.subr.msk.mxu0 %vm405_vm0, %v397_v5  ;;  %vm3478_vm8 = vcmp.ne.s32.totalorder %v366_v37, 0  ;;  %vm3488_vm11 = vcmp.ne.s32.totalorder %v374_v48, 0 }
  0x2a   : > { %2940 = vmatpush3.xpose.msk.msra.mxu1 %vm405_vm0, %v3434_v19 }
  0x2c   : > { %2933 = vmatpush3.xpose.msk.msra.mxu0 %vm405_vm0, %v397_v5 }
  0x2d   : > { %2942 = vmatmul.mubr.msk.f32.vlgmr.msra.gmra.mxu1 %vm405_vm0, %v3415_v7 }
  0x2f   : > { %2935 = vmatmul.mubr.msk.f32.vlgmr.msra.gmra.mxu0 %vm405_vm0, %v3415_v7 }
  0xed   : > { %v2943_v47 = vpop.f32.mrf.mxu1 }
  0xef   : > { %v2936_v8 = vpop.f32.mrf.mxu0  ;;  %v647_v51 = vpop.f32.mrf.mxu1 }
  0xf1   : > { %v490_v9 = vpop.f32.mrf.mxu0 }
  0xf2   : > { %501 = vrot.lane.b32.xlu0 %v490_v9, %s4100_s15 }
  0xf6   : > { %507 = vrot.lane.b32.xlu0 %v490_v9, %s4102_s16 }
  0xfa   : > { %503 = vrot.lane.b32.xlu0 %v2936_v8, %s4100_s15 }
 0x164   : > { %v502_v14 = vpop.permute.xlu0 %501 }
 0x168   : > { %v508_v16 = vpop.permute.xlu0 %507 }
 0x169   : > { %v514_v17 = vsel %vm513_vm1, %v502_v14, %v508_v16 }
 0x16a   : > { %v516_v20 = vsel %vm3423_vm2, %v514_v17, %v490_v9 }
 0x16b   : > { %520 = vrot.lane.b32.xlu1 %v516_v20, %s4096_s20 }
 0x16c   : > { %v504_v31 = vpop.permute.xlu0 %503 }
 0x16f   : > { %526 = vrot.lane.b32.xlu1 %v516_v20, %s4098_s21 }
 0x173   : > { %509 = vrot.lane.b32.xlu1 %v2936_v8, %s4102_s16 }
 0x1dd   : > { %v521_v24 = vpop.permute.xlu1 %520 }
 0x1e1   : > { %v527_v27 = vpop.permute.xlu1 %526 }
 0x1e2   : > { %v533_v28 = vsel %vm532_vm3, %v521_v24, %v527_v27 }
 0x1e3   : > { %v535_v29 = vsel %vm3451_vm4, %v533_v28, %v516_v20 }
 0x1e4   : > { %545 = vrot.lane.b32.xlu1 %v535_v29, %s4092_s23  ;;  %539 = vrot.lane.b32.xlu0 %v535_v29, %s4086_s30 }
 0x1e5   : > { %v510_v32 = vpop.permute.xlu1 %509 }
 0x1e6   : > { %v515_v33 = vsel %vm513_vm1, %v504_v31, %v510_v32 }
 0x1e7   : > { %v517_v34 = vsel %vm3460_vm5, %v515_v33, %v2936_v8  ;;  %v404_v33 = vld [vmem:[%s4076_s4 + $0x18] sm:$0xff] }
 0x1e8   : > { %528 = vrot.lane.b32.xlu1 %v517_v34, %s4098_s21  ;;  %522 = vrot.lane.b32.xlu0 %v517_v34, %s4096_s20 }
 0x1e9   : > { %2944 = vmatprep.subr.mxu1 %v404_v33 }
 0x1ea   : > { %2945 = vmatpush3.msra.mxu1 %v404_v33 }
 0x1eb   : > { %2946 = vmatprep.subr.mxu1 %v403_v35 }
 0x1ec   : > { %2947 = vmatpush3.msra.mxu1 %v403_v35 }
 0x256   : > { %v546_v38 = vpop.permute.xlu1 %545  ;;  %v540_v39 = vpop.permute.xlu0 %539 }
 0x257   : > { %v552_v40 = vsel %vm551_vm6, %v540_v39, %v546_v38  ;;  %v402_v38 = vld [vmem:[%s4076_s4 + $0x8] sm:$0xff]  ;;  %v401_v39 = vld [vmem:[%s4076_s4] sm:$0xff] }
 0x258   : > { %v554_v41 = vsel %vm3469_vm7, %v552_v40, %v535_v29  ;;  %2948 = vmatprep.subr.mxu1 %v402_v38 }
 0x259   : > { %564 = vrot.lane.b32.xlu1 %v554_v41, %s4084_s8  ;;  %558 = vrot.lane.b32.xlu0 %v554_v41, %s4104_s10  ;;  %s4153_s8 = smov 24  }
 0x25a   : > { %v529_v43 = vpop.permute.xlu1 %528  ;;  %v523_v44 = vpop.permute.xlu0 %522  ;;  %2949 = vmatpush3.msra.mxu1 %v402_v38 }
 0x25b   : > { %v534_v45 = vsel %vm532_vm3, %v523_v44, %v529_v43  ;;  %2950 = vmatprep.subr.mxu1 %v401_v39 }
 0x25c   : > { %v536_v46 = vsel %vm3478_vm8, %v534_v45, %v517_v34  ;;  %2951 = vmatpush3.msra.mxu1 %v401_v39 }
 0x25d   : > { %547 = vrot.lane.b32.xlu1 %v536_v46, %s4092_s23  ;;  %541 = vrot.lane.b32.xlu0 %v536_v46, %s4086_s30  ;;  %s3547_s23 = scalar_lea.vmem %s4150_s2, %s3396_s22  ;;  %s4094_s30 = smov 104  }
 0x25e   : > { %v3550_v45 = vld [vmem:[%s3547_s23 + $0x8] sm:$0xff]  ;;  %s4151_s22 = smov 28   ;;  %s4163_s2 = smov 127  }
 0x25f   : > { %2955 = vmatprep.subr.mxu1 %v3550_v45  ;;  %v3187_v25 = vld [vmem:[%s3547_s23 + $0x8] sm:$0xff] }
 0x2cb   : > { %v565_v49 = vpop.permute.xlu1 %564  ;;  %v559_v50 = vpop.permute.xlu0 %558 }
 0x2cc   : > { %v571_v52 = vsel %vm570_vm9, %v559_v50, %v565_v49 }
 0x2cd   : > { %v648_v53 = vadd.f32 %v647_v51, %v571_v52 }
 0x2cf   : > { %v548_v55 = vpop.permute.xlu1 %547  ;;  %v542_v56 = vpop.permute.xlu0 %541  ;;  %v657_v57 = vsel %vm656_vm10, %v648_v53, -inf }
 0x2d0   : > { %v553_v58 = vsel %vm551_vm6, %v542_v56, %v548_v55  ;;  %658 = vmax.xlane.f32.xlu0 %v657_v57 }
 0x2d1   : > { %v555_v59 = vsel %vm3488_vm11, %v553_v58, %v536_v46  ;;  %v3572_v58 = vld [vmem:[%s3547_s23] sm:$0xff] }
 0x2d2   : > { %v653_v60 = vadd.f32 %v2943_v47, %v555_v59  ;;  %v2765_v59 = vld [vmem:[%s4075_s3 + $0x38] sm:$0xff] }
 0x2d4   : > { %v660_v61 = vsel %vm656_vm10, %v653_v60, -inf }
 0x2d5   : > { %661 = vmax.xlane.f32.xlu1 %v660_v61 }
 0x359   : > { %v659_v62 = vpop.xlane.xlu0 %658 }
 0x35a   : > { %v663_v63 = vsub.f32 %v648_v53, %v659_v62  ;;  %v2764_v62 = vld [vmem:[%s4075_s3 + $0x30] sm:$0xff] }
 0x35c   : > { %v665_v0 = vmul.f32 1.442695, %v663_v63 }
 0x35e   : > { %3155 = vpow2.f32 %v665_v0  ;;  %v662_v1 = vpop.xlane.xlu1 %661 }
 0x35f   : > { %v664_v2 = vsub.f32 %v653_v60, %v662_v1  ;;  %v2763_v1 = vld [vmem:[%s4075_s3 + $0x28] sm:$0xff] }
 0x361   : > { %v667_v3 = vmul.f32 1.442695, %v664_v2  ;;  %v2762_v2 = vld [vmem:[%s4075_s3 + $0x20] sm:$0xff] }
 0x363   : > { %3157 = vpow2.f32 %v667_v3 }
 0x36b   : > { %v3156_v5 = vpop.eup %3155 }
 0x36c   : > { %v669_v6 = vsel %vm656_vm10, %v3156_v5, 0.0 }
 0x36d   : > { %670 = vadd.xlane.f32.xlu0 %v669_v6 }
 0x370   : > { %v3158_v8 = vpop.eup %3157 }
 0x371   : > { %v672_v9 = vsel %vm656_vm10, %v3158_v8, 0.0 }
 0x372   : > { %673 = vadd.xlane.f32.xlu0 %v672_v9 }
 0x3f6   : > { %v671_v10 = vpop.xlane.xlu0 %670 }
 0x3f7   : > { %3159 = vrcp.f32 %v671_v10 }
 0x3fb   : > { %v674_v11 = vpop.xlane.xlu0 %673 }
 0x3fc   : > { %3161 = vrcp.f32 %v674_v11 }
 0x404   : > { %v3160_v12 = vpop.eup %3159 }
 0x405   : > { %v3499_v13 = vmul.f32 %v3160_v12, %v3156_v5 }
 0x407   : > { %v679_v14 = vsel %vm656_vm10, %v3499_v13, 0.0 }
 0x408   : > { %689 = vrot.lane.b32.xlu0 %v679_v14, %s4082_s12  ;;  %683 = vrot.lane.b32.xlu1 %v679_v14, %s4080_s17 }
 0x409   : > { %v3162_v16 = vpop.eup %3161 }
 0x40a   : > { %v3505_v17 = vmul.f32 %v3162_v16, %v3158_v8 }
 0x40c   : > { %v680_v20 = vsel %vm656_vm10, %v3505_v17, 0.0 }
 0x40d   : > { %685 = vrot.lane.b32.xlu1 %v680_v20, %s4080_s17  ;;  %s4106_s17 = smov 8  }
 0x411   : > { %691 = vrot.lane.b32.xlu1 %v680_v20, %s4082_s12  ;;  %s4154_s12 = smov 1  }
 0x47a   : > { %v684_v21 = vpop.permute.xlu1 %683  ;;  %v690_v22 = vpop.permute.xlu0 %689 }
 0x47b   : > { %v696_v23 = vsel %vm695_vm12, %v684_v21, %v690_v22 }
 0x47c   : > { %v698_v24 = vsel %vm3423_vm2, %v696_v23, %v679_v14 }
 0x47d   : > { %708 = vrot.lane.b32.xlu1 %v698_v24, %s4088_s18  ;;  %702 = vrot.lane.b32.xlu0 %v698_v24, %s4090_s19 }
 0x47f   : > { %v686_v26 = vpop.permute.xlu1 %685 }
 0x483   : > { %v692_v27 = vpop.permute.xlu1 %691 }
 0x484   : > { %v697_v28 = vsel %vm695_vm12, %v686_v26, %v692_v27 }
 0x485   : > { %v699_v29 = vsel %vm3460_vm5, %v697_v28, %v680_v20 }
 0x486   : > { %710 = vrot.lane.b32.xlu1 %v699_v29, %s4088_s18  ;;  %704 = vrot.lane.b32.xlu0 %v699_v29, %s4090_s19  ;;  %s4109_s18 = smov 4   ;;  %s3280_s19 = smov 100  }
 0x4ef   : > { %v709_v31 = vpop.permute.xlu1 %708  ;;  %v703_v32 = vpop.permute.xlu0 %702 }
 0x4f0   : > { %v715_v34 = vsel %vm714_vm13, %v703_v32, %v709_v31 }
 0x4f1   : > { %v717_v37 = vsel %vm3451_vm4, %v715_v34, %v698_v24 }
 0x4f2   : > { %727 = vrot.lane.b32.xlu1 %v717_v37, %s4109_s18  ;;  %721 = vrot.lane.b32.xlu0 %v717_v37, %s3280_s19 }
 0x4f8   : > { %v711_v40 = vpop.permute.xlu1 %710  ;;  %v705_v41 = vpop.permute.xlu0 %704 }
 0x4f9   : > { %v716_v43 = vsel %vm714_vm13, %v705_v41, %v711_v40 }
 0x4fa   : > { %v718_v44 = vsel %vm3478_vm8, %v716_v43, %v699_v29 }
 0x4fb   : > { %729 = vrot.lane.b32.xlu1 %v718_v44, %s4109_s18  ;;  %723 = vrot.lane.b32.xlu0 %v718_v44, %s3280_s19 }
 0x564   : > { %v728_v46 = vpop.permute.xlu1 %727  ;;  %v722_v47 = vpop.permute.xlu0 %721 }
 0x565   : > { %v734_v48 = vsel %vm733_vm14, %v722_v47, %v728_v46 }
 0x566   : > { %v736_v49 = vsel %vm3469_vm7, %v734_v48, %v717_v37 }
 0x567   : > { %746 = vrot.lane.b32.xlu1 %v736_v49, %s4106_s17  ;;  %740 = vrot.lane.b32.xlu0 %v736_v49, %s4094_s30  ;;  %s4152_s30 = smov 124   ;;  %s4164_s17 = smov 30  }
 0x56b   : > { %929 = vrot.lane.b32.xlu0 %v3404_v4, %s4104_s10  ;;  %931 = vrot.lane.b32.xlu1 %v3415_v7, %s4104_s10 }
 0x56d   : > { %v730_v50 = vpop.permute.xlu1 %729  ;;  %v724_v51 = vpop.permute.xlu0 %723 }
 0x56e   : > { %v735_v52 = vsel %vm733_vm14, %v724_v51, %v730_v50 }
 0x56f   : > { %1098 = vrot.lane.b32.xlu0 %v3432_v18, %s4104_s10  ;;  %1096 = vrot.lane.b32.xlu1 %v3434_v19, %s4104_s10  ;;  %v737_v57 = vsel %vm3488_vm11, %v735_v52, %v718_v44 }
 0x5d9   : > { %v747_v53 = vpop.permute.xlu1 %746  ;;  %v741_v55 = vpop.permute.xlu0 %740 }
 0x5da   : > { %v752_v56 = vsel %vm405_vm0, %v741_v55, %v747_v53 }
 0x5db   : > { %2952 = vmatprep.mubr.msk.f32.mxu1 %vm756_vm15, %v752_v56 }
 0x5dc   : > { %2953 = vmatmul.mubr.msk.f32.vlgmr.msra.gmra.mxu1 %vm756_vm15, %v737_v57 }
 0x5dd   : > { %2956 = vmatpush3.msra.mxu1 %v3550_v45  ;;  %2959 = vmatprep.mubr.msk.f32.mxu1 %vm656_vm10, %v3499_v13  ;;  %v930_v60 = vpop.permute.xlu0 %929  ;;  %v932_v61 = vpop.permute.xlu1 %931 }
 0x5de   : > { %2957 = vmatprep.subr.mxu1 %v3572_v58  ;;  %2977 = vmatprep.mubr.msk.f32.mxu0 %vm405_vm0, %v930_v60 }
 0x5df   : > { %2958 = vmatpush3.msra.mxu1 %v3572_v58 }
 0x5e0   : > { %2962 = vmatprep.subr.msk.mxu1 %vm405_vm0, %v2765_v59  ;;  %2960 = vmatmul.mubr.msk.f32.vlgmr.msra.gmra.mxu1 %vm656_vm10, %v3505_v17 }
 0x5e1   : > { %2963 = vmatpush3.xpose.msk.msra.mxu1 %vm405_vm0, %v2765_v59  ;;  %v1099_v63 = vpop.permute.xlu0 %1098  ;;  %v1097_v0 = vpop.permute.xlu1 %1096  ;;  %2970 = vmatprep.mubr.msk.f32.mxu1 %vm405_vm0, %v930_v60 }
 0x5e2   : > { %2964 = vmatprep.subr.msk.mxu1 %vm405_vm0, %v2764_v62  ;;  %2973 = vmatprep.subr.msk.mxu0 %vm405_vm0, %v1099_v63 }
 0x5e3   : > { %2974 = vmatpush3.xpose.msk.msra.mxu0 %vm405_vm0, %v1099_v63 }
 0x5e4   : > { %2975 = vmatprep.subr.msk.mxu0 %vm405_vm0, %v1097_v0 }
 0x5e5   : > { %2965 = vmatpush3.xpose.msk.msra.mxu1 %vm405_vm0, %v2764_v62 }
 0x5e6   : > { %2966 = vmatprep.subr.msk.mxu1 %vm405_vm0, %v2763_v1 }
 0x5e7   : > { %2976 = vmatpush3.xpose.msk.msra.mxu0 %vm405_vm0, %v1097_v0 }
 0x5e9   : > { %2967 = vmatpush3.xpose.msk.msra.mxu1 %vm405_vm0, %v2763_v1 }
 0x5ea   : > { %2968 = vmatprep.subr.msk.mxu1 %vm405_vm0, %v2762_v2  ;;  %2978 = vmatmul.mubr.msk.f32.vlgmr.msra.gmra.mxu0 %vm405_vm0, %v932_v61 }
 0x5ed   : > { %2969 = vmatpush3.xpose.msk.msra.mxu1 %vm405_vm0, %v2762_v2 }
 0x5f0   : > { %2971 = vmatmul.mubr.msk.f32.vlgmr.msra.gmra.mxu1 %vm405_vm0, %v932_v61 }
 0x69c   : > { %v2954_v3 = vpop.f32.mrf.mxu1 }
 0x69e   : > { %v829_v5 = vpop.f32.mrf.mxu1 }
 0x6a0   : > { %v2961_v6 = vpop.f32.mrf.mxu1 }
 0x6a1   : > { %v3610_v8 = vadd.f32 %v2961_v6, %v2954_v3 }
 0x6a2   : > { %v910_v9 = vpop.f32.mrf.mxu1 }
 0x6a3   : > { %v3612_v10 = vadd.f32 %v910_v9, %v829_v5 }
 0x6aa   : > { %v2979_v39 = vpop.f32.mrf.mxu0 }
 0x6ac   : > { %v1170_v43 = vpop.f32.mrf.mxu0 }
 0x6b0   : > { %v2972_v11 = vpop.f32.mrf.mxu1 }
 0x6b2   : > { %v1015_v12 = vpop.f32.mrf.mxu1 }
 0x6b3   : > { %1032 = vrot.lane.b32.xlu1 %v1015_v12, %s4102_s16  ;;  %1026 = vrot.lane.b32.xlu0 %v1015_v12, %s4100_s15 }
 0x725   : > { %v1033_v13 = vpop.permute.xlu1 %1032  ;;  %v1027_v14 = vpop.permute.xlu0 %1026 }
 0x726   : > { %v1038_v16 = vsel %vm513_vm1, %v1027_v14, %v1033_v13 }
 0x727   : > { %v1040_v17 = vsel %vm3423_vm2, %v1038_v16, %v1015_v12 }
 0x728   : > { %1050 = vrot.lane.b32.xlu1 %v1040_v17, %s4098_s21  ;;  %1044 = vrot.lane.b32.xlu0 %v1040_v17, %s4096_s20 }
 0x72c   : > { %1034 = vrot.lane.b32.xlu1 %v2972_v11, %s4102_s16  ;;  %1028 = vrot.lane.b32.xlu0 %v2972_v11, %s4100_s15  ;;  %s4157_s15 = smov 98   ;;  %s4160_s16 = smov 104  }
 0x79a   : > { %v1051_v20 = vpop.permute.xlu1 %1050  ;;  %v1045_v21 = vpop.permute.xlu0 %1044 }
 0x79b   : > { %v1056_v22 = vsel %vm532_vm3, %v1045_v21, %v1051_v20 }
 0x79c   : > { %v1058_v23 = vsel %vm3451_vm4, %v1056_v22, %v1040_v17 }
 0x79d   : > { %1068 = vrot.lane.b32.xlu1 %v1058_v23, %s4151_s22  ;;  %1062 = vrot.lane.b32.xlu0 %v1058_v23, %s4152_s30 }
 0x79e   : > { %v1035_v24 = vpop.permute.xlu1 %1034  ;;  %v1029_v26 = vpop.permute.xlu0 %1028 }
 0x79f   : > { %v1039_v27 = vsel %vm513_vm1, %v1029_v26, %v1035_v24 }
 0x7a0   : > { %v1041_v28 = vsel %vm3460_vm5, %v1039_v27, %v2972_v11 }
 0x7a1   : > { %1052 = vrot.lane.b32.xlu1 %v1041_v28, %s4098_s21  ;;  %1046 = vrot.lane.b32.xlu0 %v1041_v28, %s4096_s20  ;;  %s4155_s20 = smov 97   ;;  %s4156_s21 = smov 2  }
 0x80f   : > { %v1069_v29 = vpop.permute.xlu1 %1068  ;;  %v1063_v31 = vpop.permute.xlu0 %1062 }
 0x810   : > { %v1074_v32 = vsel %vm551_vm6, %v1063_v31, %v1069_v29  ;;  %v2769_v31 = vld [vmem:[%s4076_s4 + $0x38] sm:$0xff] }
 0x811   : > { %v1076_v33 = vsel %vm3469_vm7, %v1074_v32, %v1058_v23  ;;  %v2768_v32 = vld [vmem:[%s4076_s4 + $0x30] sm:$0xff]  ;;  %2980 = vmatprep.subr.mxu0 %v2769_v31 }
 0x812   : > { %1086 = vrot.lane.b32.xlu1 %v1076_v33, %s4153_s8  ;;  %1080 = vrot.lane.b32.xlu0 %v1076_v33, %s4104_s10  ;;  %v2767_v33 = vld [vmem:[%s4076_s4 + $0x28] sm:$0xff]  ;;  %s4111_s10 = smov 112  }
 0x813   : > { %v1053_v34 = vpop.permute.xlu1 %1052  ;;  %v1047_v35 = vpop.permute.xlu0 %1046  ;;  %2981 = vmatpush3.msra.mxu0 %v2769_v31 }
 0x814   : > { %v1057_v37 = vsel %vm532_vm3, %v1047_v35, %v1053_v34  ;;  %2982 = vmatprep.subr.mxu0 %v2768_v32  ;;  %v2766_v34 = vld [vmem:[%s4076_s4 + $0x20] sm:$0xff] }
 0x815   : > { %v1059_v38 = vsel %vm3478_vm8, %v1057_v37, %v1041_v28  ;;  %2983 = vmatpush3.msra.mxu0 %v2768_v32 }
 0x816   : > { %1070 = vrot.lane.b32.xlu1 %v1059_v38, %s4151_s22  ;;  %1064 = vrot.lane.b32.xlu0 %v1059_v38, %s4152_s30 }
 0x817   : > { %2984 = vmatprep.subr.mxu0 %v2767_v33 }
 0x818   : > { %2985 = vmatpush3.msra.mxu0 %v2767_v33 }
 0x819   : > { %2986 = vmatprep.subr.mxu0 %v2766_v34 }
 0x81a   : > { %2987 = vmatpush3.msra.mxu0 %v2766_v34 }
 0x884   : > { %v1087_v40 = vpop.permute.xlu1 %1086  ;;  %v1081_v41 = vpop.permute.xlu0 %1080 }
 0x885   : > { %v1092_v44 = vsel %vm570_vm9, %v1081_v41, %v1087_v40  ;;  %v2787_v40 = vld [vmem:[%s4075_s3 + $0x58] sm:$0xff] }
 0x886   : > { %v1171_v46 = vadd.f32 %v1170_v43, %v1092_v44  ;;  %2998 = vmatprep.subr.msk.mxu0 %vm405_vm0, %v2787_v40 }
 0x888   : > { %v1071_v47 = vpop.permute.xlu1 %1070  ;;  %v1065_v48 = vpop.permute.xlu0 %1064  ;;  %v1179_v49 = vsel %vm656_vm10, %v1171_v46, -inf }
 0x889   : > { %v1075_v50 = vsel %vm551_vm6, %v1065_v48, %v1071_v47  ;;  %1180 = vmax.xlane.f32.xlu0 %v1179_v49 }
 0x88a   : > { %v1077_v51 = vsel %vm3488_vm11, %v1075_v50, %v1059_v38 }
 0x88b   : > { %v1176_v52 = vadd.f32 %v2979_v39, %v1077_v51 }
 0x88d   : > { %v1182_v53 = vsel %vm656_vm10, %v1176_v52, -inf }
 0x88e   : > { %1183 = vmax.xlane.f32.xlu1 %v1182_v53 }
 0x912   : > { %v1181_v55 = vpop.xlane.xlu0 %1180 }
 0x913   : > { %v1185_v56 = vsub.f32 %v1171_v46, %v1181_v55  ;;  %v2786_v55 = vld [vmem:[%s4075_s3 + $0x50] sm:$0xff] }
 0x915   : > { %v1187_v57 = vmul.f32 1.442695, %v1185_v56 }
 0x917   : > { %3163 = vpow2.f32 %v1187_v57  ;;  %v1184_v59 = vpop.xlane.xlu1 %1183 }
 0x918   : > { %v1186_v60 = vsub.f32 %v1176_v52, %v1184_v59  ;;  %v2785_v59 = vld [vmem:[%s4075_s3 + $0x48] sm:$0xff] }
 0x91a   : > { %v1189_v61 = vmul.f32 1.442695, %v1186_v60 }
 0x91c   : > { %3165 = vpow2.f32 %v1189_v61 }
 0x924   : > { %v3164_v62 = vpop.eup %3163 }
 0x925   : > { %v1191_v63 = vsel %vm656_vm10, %v3164_v62, 0.0 }
 0x926   : > { %1192 = vadd.xlane.f32.xlu0 %v1191_v63 }
 0x929   : > { %v3166_v0 = vpop.eup %3165 }
 0x92a   : > { %v1194_v1 = vsel %vm656_vm10, %v3166_v0, 0.0 }
 0x92b   : > { %1195 = vadd.xlane.f32.xlu0 %v1194_v1 }
 0x9af   : > { %v1193_v2 = vpop.xlane.xlu0 %1192 }
 0x9b0   : > { %3167 = vrcp.f32 %v1193_v2 }
 0x9b4   : > { %v1196_v3 = vpop.xlane.xlu0 %1195 }
 0x9b5   : > { %3169 = vrcp.f32 %v1196_v3 }
 0x9bd   : > { %v3168_v5 = vpop.eup %3167 }
 0x9be   : > { %v1199_v6 = vmul.f32 %v3168_v5, %v3164_v62  ;;  %v2784_v62 = vld [vmem:[%s4075_s3 + $0x40] sm:$0xff] }
 0x9c0   : > { %2995 = vmatprep.mubr.msk.f32.mxu1 %vm656_vm10, %v1199_v6  ;;  %v1201_v9 = vsel %vm656_vm10, %v1199_v6, 0.0 }
 0x9c1   : > { %1211 = vrot.lane.b32.xlu0 %v1201_v9, %s4154_s12  ;;  %1205 = vrot.lane.b32.xlu1 %v1201_v9, %s4155_s20 }
 0x9c2   : > { %v3170_v11 = vpop.eup %3169 }
 0x9c3   : > { %v3655_v12 = vmul.f32 %v3170_v11, %v3166_v0 }
 0x9c5   : > { %v1202_v13 = vsel %vm656_vm10, %v3655_v12, 0.0 }
 0x9c6   : > { %1207 = vrot.lane.b32.xlu1 %v1202_v13, %s4155_s20 }
 0x9ca   : > { %1213 = vrot.lane.b32.xlu1 %v1202_v13, %s4154_s12 }
 0xa33   : > { %v1206_v14 = vpop.permute.xlu1 %1205  ;;  %v1212_v16 = vpop.permute.xlu0 %1211 }
 0xa34   : > { %v1217_v17 = vsel %vm695_vm12, %v1206_v14, %v1212_v16 }
 0xa35   : > { %v1219_v20 = vsel %vm3423_vm2, %v1217_v17, %v1201_v9 }
 0xa36   : > { %1229 = vrot.lane.b32.xlu1 %v1219_v20, %s4156_s21  ;;  %1223 = vrot.lane.b32.xlu0 %v1219_v20, %s4157_s15 }
 0xa38   : > { %v1208_v21 = vpop.permute.xlu1 %1207 }
 0xa3c   : > { %v1214_v22 = vpop.permute.xlu1 %1213 }
 0xa3d   : > { %v1218_v23 = vsel %vm695_vm12, %v1208_v21, %v1214_v22 }
 0xa3e   : > { %v1220_v24 = vsel %vm3460_vm5, %v1218_v23, %v1202_v13 }
 0xa3f   : > { %1231 = vrot.lane.b32.xlu1 %v1220_v24, %s4156_s21  ;;  %1225 = vrot.lane.b32.xlu0 %v1220_v24, %s4157_s15 }
 0xaa8   : > { %v1230_v26 = vpop.permute.xlu1 %1229  ;;  %v1224_v27 = vpop.permute.xlu0 %1223 }
 0xaa9   : > { %v1235_v28 = vsel %vm714_vm13, %v1224_v27, %v1230_v26 }
 0xaaa   : > { %v1237_v29 = vsel %vm3451_vm4, %v1235_v28, %v1219_v20 }
 0xaab   : > { %1247 = vrot.lane.b32.xlu1 %v1237_v29, %s4109_s18  ;;  %1241 = vrot.lane.b32.xlu0 %v1237_v29, %s3280_s19  ;;  %s4161_s18 = smov 120  }
 0xab1   : > { %v1232_v35 = vpop.permute.xlu1 %1231  ;;  %v1226_v37 = vpop.permute.xlu0 %1225 }
 0xab2   : > { %v1236_v38 = vsel %vm714_vm13, %v1226_v37, %v1232_v35 }
 0xab3   : > { %v1238_v39 = vsel %vm3478_vm8, %v1236_v38, %v1220_v24 }
 0xab4   : > { %1249 = vrot.lane.b32.xlu1 %v1238_v39, %s4158_s0  ;;  %1243 = vrot.lane.b32.xlu0 %v1238_v39, %s3280_s19 }
 0xb1d   : > { %v1248_v41 = vpop.permute.xlu1 %1247  ;;  %v1242_v43 = vpop.permute.xlu0 %1241 }
 0xb1e   : > { %v1253_v44 = vsel %vm733_vm14, %v1242_v43, %v1248_v41 }
 0xb1f   : > { %v1255_v46 = vsel %vm3469_vm7, %v1253_v44, %v1237_v29 }
 0xb20   : > { %1265 = vrot.lane.b32.xlu1 %v1255_v46, %s4159_s9  ;;  %1259 = vrot.lane.b32.xlu0 %v1255_v46, %s4160_s16 }
 0xb24   : > { %1455 = vrot.lane.b32.xlu0 %v3404_v4, %s4111_s10  ;;  %1457 = vrot.lane.b32.xlu1 %v3415_v7, %s4111_s10 }
 0xb26   : > { %v1250_v47 = vpop.permute.xlu1 %1249  ;;  %v1244_v48 = vpop.permute.xlu0 %1243 }
 0xb27   : > { %v1254_v49 = vsel %vm733_vm14, %v1244_v48, %v1250_v47 }
 0xb28   : > { %1360 = vrot.lane.b32.xlu0 %v3550_v45, %s4161_s18  ;;  %1358 = vrot.lane.b32.xlu1 %v3572_v58, %s4161_s18  ;;  %v1256_v53 = vsel %vm3488_vm11, %v1254_v49, %v1238_v39 }
 0xb2c   : > { %1624 = vrot.lane.b32.xlu0 %v3432_v18, %s4111_s10  ;;  %1622 = vrot.lane.b32.xlu1 %v3434_v19, %s4111_s10  ;;  %s4162_s10 = smov 31  }
 0xb92   : > { %v1266_v50 = vpop.permute.xlu1 %1265  ;;  %v1260_v51 = vpop.permute.xlu0 %1259 }
 0xb93   : > { %v1271_v52 = vsel %vm405_vm0, %v1260_v51, %v1266_v50 }
 0xb94   : > { %2988 = vmatprep.mubr.msk.f32.mxu0 %vm756_vm15, %v1271_v52 }
 0xb95   : > { %2989 = vmatmul.mubr.msk.f32.vlgmr.msra.gmra.mxu0 %vm756_vm15, %v1256_v53 }
 0xb96   : > { %2999 = vmatpush3.xpose.msk.msra.mxu0 %vm405_vm0, %v2787_v40  ;;  %v1456_v56 = vpop.permute.xlu0 %1455  ;;  %v1458_v57 = vpop.permute.xlu1 %1457 }
 0xb97   : > { %3000 = vmatprep.subr.msk.mxu0 %vm405_vm0, %v2786_v55  ;;  %3006 = vmatprep.mubr.msk.f32.mxu0 %vm405_vm0, %v1456_v56 }
 0xb9a   : > { %3001 = vmatpush3.xpose.msk.msra.mxu0 %vm405_vm0, %v2786_v55  ;;  %v1361_v60 = vpop.permute.xlu0 %1360  ;;  %v1359_v61 = vpop.permute.xlu1 %1358 }
 0xb9b   : > { %2991 = vmatprep.subr.mxu1 %v1361_v60  ;;  %3002 = vmatprep.subr.msk.mxu0 %vm405_vm0, %v2785_v59 }
 0xb9c   : > { %2992 = vmatpush3.msra.mxu1 %v1361_v60 }
 0xb9d   : > { %2993 = vmatprep.subr.mxu1 %v1359_v61 }
 0xb9e   : > { %3003 = vmatpush3.xpose.msk.msra.mxu0 %vm405_vm0, %v2785_v59  ;;  %2994 = vmatpush3.msra.mxu1 %v1359_v61  ;;  %v1625_v63 = vpop.permute.xlu0 %1624  ;;  %v1623_v0 = vpop.permute.xlu1 %1622 }
 0xb9f   : > { %2996 = vmatmul.mubr.msk.f32.vlgmr.msra.gmra.mxu1 %vm656_vm10, %v3655_v12  ;;  %3009 = vmatprep.subr.msk.mxu1 %vm405_vm0, %v1625_v63 }
 0xba0   : > { %3004 = vmatprep.subr.msk.mxu0 %vm405_vm0, %v2784_v62  ;;  %3010 = vmatpush3.xpose.msk.msra.mxu1 %vm405_vm0, %v1625_v63 }
 0xba1   : > { %3011 = vmatprep.subr.msk.mxu1 %vm405_vm0, %v1623_v0  ;;  %3013 = vmatprep.mubr.msk.f32.mxu1 %vm405_vm0, %v1456_v56 }
 0xba2   : > { %3005 = vmatpush3.xpose.msk.msra.mxu0 %vm405_vm0, %v2784_v62 }
 0xba4   : > { %3012 = vmatpush3.xpose.msk.msra.mxu1 %vm405_vm0, %v1623_v0 }
 0xba5   : > { %3007 = vmatmul.mubr.msk.f32.vlgmr.msra.gmra.mxu0 %vm405_vm0, %v1458_v57 }
 0xba7   : > { %3014 = vmatmul.mubr.msk.f32.vlgmr.msra.gmra.mxu1 %vm405_vm0, %v1458_v57 }
 0xc55   : > { %v2990_v1 = vpop.f32.mrf.mxu0 }
 0xc57   : > { %v1347_v5 = vpop.f32.mrf.mxu0 }
 0xc5f   : > { %v2997_v2 = vpop.f32.mrf.mxu1 }
 0xc60   : > { %v3746_v3 = vadd.f32 %v2997_v2, %v2990_v1 }
 0xc61   : > { %v1436_v6 = vpop.f32.mrf.mxu1 }
 0xc62   : > { %v3748_v9 = vadd.f32 %v1436_v6, %v1347_v5 }
 0xc65   : > { %v3008_v11 = vpop.f32.mrf.mxu0 }
 0xc67   : > { %v1541_v12 = vpop.f32.mrf.mxu0  ;;  %v3015_v39 = vpop.f32.mrf.mxu1 }
 0xc68   : > { %1558 = vrot.lane.b32.xlu1 %v1541_v12, %s4162_s10  ;;  %1552 = vrot.lane.b32.xlu0 %v1541_v12, %s4163_s2 }
 0xc69   : > { %v1696_v43 = vpop.f32.mrf.mxu1 }
 0xcda   : > { %v1559_v13 = vpop.permute.xlu1 %1558  ;;  %v1553_v14 = vpop.permute.xlu0 %1552 }
 0xcdb   : > { %v1564_v16 = vsel %vm513_vm1, %v1553_v14, %v1559_v13 }
 0xcdc   : > { %v1566_v17 = vsel %vm3423_vm2, %v1564_v16, %v1541_v12 }
 0xcdd   : > { %1576 = vrot.lane.b32.xlu1 %v1566_v17, %s4164_s17  ;;  %1570 = vrot.lane.b32.xlu0 %v1566_v17, %s4165_s1 }
 0xce1   : > { %1560 = vrot.lane.b32.xlu1 %v3008_v11, %s4162_s10  ;;  %1554 = vrot.lane.b32.xlu0 %v3008_v11, %s4163_s2 }
 0xd4f   : > { %v1577_v20 = vpop.permute.xlu1 %1576  ;;  %v1571_v21 = vpop.permute.xlu0 %1570 }
 0xd50   : > { %v1582_v22 = vsel %vm532_vm3, %v1571_v21, %v1577_v20 }
 0xd51   : > { %v1584_v23 = vsel %vm3451_vm4, %v1582_v22, %v1566_v17 }
 0xd52   : > { %1594 = vrot.lane.b32.xlu1 %v1584_v23, %s4151_s22  ;;  %1588 = vrot.lane.b32.xlu0 %v1584_v23, %s4152_s30 }
 0xd53   : > { %v1561_v24 = vpop.permute.xlu1 %1560  ;;  %v1555_v26 = vpop.permute.xlu0 %1554 }
 0xd54   : > { %v1565_v27 = vsel %vm513_vm1, %v1555_v26, %v1561_v24 }
 0xd55   : > { %v1567_v28 = vsel %vm3460_vm5, %v1565_v27, %v3008_v11 }
 0xd56   : > { %1578 = vrot.lane.b32.xlu1 %v1567_v28, %s4164_s17  ;;  %1572 = vrot.lane.b32.xlu0 %v1567_v28, %s4165_s1 }
 0xdc4   : > { %v1595_v29 = vpop.permute.xlu1 %1594  ;;  %v1589_v31 = vpop.permute.xlu0 %1588 }
 0xdc5   : > { %v1600_v32 = vsel %vm551_vm6, %v1589_v31, %v1595_v29 }
 0xdc6   : > { %v1602_v33 = vsel %vm3469_vm7, %v1600_v32, %v1584_v23 }
 0xdc7   : > { %1612 = vrot.lane.b32.xlu1 %v1602_v33, %s4153_s8  ;;  %1606 = vrot.lane.b32.xlu0 %v1602_v33, %s4161_s18  ;;  %v2791_v33 = vld [vmem:[%s4076_s4 + $0x58] sm:$0xff] }
 0xdc8   : > { %v1579_v34 = vpop.permute.xlu1 %1578  ;;  %v1573_v35 = vpop.permute.xlu0 %1572  ;;  %3016 = vmatprep.subr.mxu1 %v2791_v33 }
 0xdc9   : > { %v1583_v37 = vsel %vm532_vm3, %v1573_v35, %v1579_v34  ;;  %v2790_v34 = vld [vmem:[%s4076_s4 + $0x50] sm:$0xff]  ;;  %3017 = vmatpush3.msra.mxu1 %v2791_v33  ;;  %v2789_v35 = vld [vmem:[%s4076_s4 + $0x48] sm:$0xff] }
 0xdca   : > { %v1585_v38 = vsel %vm3478_vm8, %v1583_v37, %v1567_v28  ;;  %3018 = vmatprep.subr.mxu1 %v2790_v34  ;;  %v2788_v37 = vld [vmem:[%s4076_s4 + $0x40] sm:$0xff] }
 0xdcb   : > { %1596 = vrot.lane.b32.xlu1 %v1585_v38, %s4151_s22  ;;  %1590 = vrot.lane.b32.xlu0 %v1585_v38, %s4152_s30 }
 0xdcc   : > { %3019 = vmatpush3.msra.mxu1 %v2790_v34 }
 0xdcd   : > { %3020 = vmatprep.subr.mxu1 %v2789_v35 }
 0xdce   : > { %3021 = vmatpush3.msra.mxu1 %v2789_v35 }
 0xdcf   : > { %3022 = vmatprep.subr.mxu1 %v2788_v37 }
 0xdd0   : > { %3023 = vmatpush3.msra.mxu1 %v2788_v37 }
 0xe39   : > { %v1613_v40 = vpop.permute.xlu1 %1612  ;;  %v1607_v41 = vpop.permute.xlu0 %1606 }
 0xe3a   : > { %v1618_v44 = vsel %vm570_vm9, %v1607_v41, %v1613_v40 }
 0xe3b   : > { %v1697_v46 = vadd.f32 %v1696_v43, %v1618_v44  ;;  %v2809_v43 = vld [vmem:[%s4075_s3 + $0x78] sm:$0xff] }
 0xe3c   : > { %3034 = vmatprep.subr.msk.mxu1 %vm405_vm0, %v2809_v43 }
 0xe3d   : > { %v1597_v47 = vpop.permute.xlu1 %1596  ;;  %v1591_v48 = vpop.permute.xlu0 %1590  ;;  %v1705_v49 = vsel %vm656_vm10, %v1697_v46, -inf }
 0xe3e   : > { %v1601_v50 = vsel %vm551_vm6, %v1591_v48, %v1597_v47  ;;  %1706 = vmax.xlane.f32.xlu0 %v1705_v49 }
 0xe3f   : > { %v1603_v51 = vsel %vm3488_vm11, %v1601_v50, %v1585_v38 }
 0xe40   : > { %v1702_v52 = vadd.f32 %v3015_v39, %v1603_v51 }
 0xe42   : > { %v1708_v53 = vsel %vm656_vm10, %v1702_v52, -inf }
 0xe43   : > { %1709 = vmax.xlane.f32.xlu1 %v1708_v53  ;;  %v2807_v53 = vld [vmem:[%s4075_s3 + $0x68] sm:$0xff] }
 0xec7   : > { %v1707_v55 = vpop.xlane.xlu0 %1706 }
 0xec8   : > { %v1711_v56 = vsub.f32 %v1697_v46, %v1707_v55 }
 0xeca   : > { %v1713_v57 = vmul.f32 1.442695, %v1711_v56 }
 0xecc   : > { %3171 = vpow2.f32 %v1713_v57  ;;  %v1710_v59 = vpop.xlane.xlu1 %1709  ;;  %v2806_v57 = vld [vmem:[%s4075_s3 + $0x60] sm:$0xff] }
 0xecd   : > { %v1712_v60 = vsub.f32 %v1702_v52, %v1710_v59 }
 0xecf   : > { %v1715_v61 = vmul.f32 1.442695, %v1712_v60 }
 0xed1   : > { %3173 = vpow2.f32 %v1715_v61 }
 0xed9   : > { %v3172_v62 = vpop.eup %3171 }
 0xeda   : > { %v1717_v63 = vsel %vm656_vm10, %v3172_v62, 0.0 }
 0xedb   : > { %1718 = vadd.xlane.f32.xlu0 %v1717_v63 }
 0xede   : > { %v3174_v0 = vpop.eup %3173 }
 0xedf   : > { %v1720_v1 = vsel %vm656_vm10, %v3174_v0, 0.0 }
 0xee0   : > { %1721 = vadd.xlane.f32.xlu0 %v1720_v1 }
 0xf64   : > { %v1719_v2 = vpop.xlane.xlu0 %1718 }
 0xf65   : > { %3175 = vrcp.f32 %v1719_v2 }
 0xf69   : > { %v1722_v5 = vpop.xlane.xlu0 %1721 }
 0xf6a   : > { %3177 = vrcp.f32 %v1722_v5 }
 0xf72   : > { %v3176_v6 = vpop.eup %3175 }
 0xf73   : > { %v1725_v11 = vmul.f32 %v3176_v6, %v3172_v62 }
 0xf75   : > { %3031 = vmatprep.mubr.msk.f32.mxu0 %vm656_vm10, %v1725_v11  ;;  %v1727_v12 = vsel %vm656_vm10, %v1725_v11, 0.0 }
 0xf76   : > { %1737 = vrot.lane.b32.xlu0 %v1727_v12, %s4154_s12  ;;  %1731 = vrot.lane.b32.xlu1 %v1727_v12, %s4155_s20 }
 0xf77   : > { %v3178_v13 = vpop.eup %3177 }
 0xf78   : > { %v3791_v14 = vmul.f32 %v3178_v13, %v3174_v0 }
 0xf7a   : > { %v1728_v16 = vsel %vm656_vm10, %v3791_v14, 0.0 }
 0xf7b   : > { %1733 = vrot.lane.b32.xlu1 %v1728_v16, %s4155_s20 }
 0xf7f   : > { %1739 = vrot.lane.b32.xlu1 %v1728_v16, %s4154_s12 }
 0xfe8   : > { %v1732_v17 = vpop.permute.xlu1 %1731  ;;  %v1738_v20 = vpop.permute.xlu0 %1737 }
 0xfe9   : > { %v1743_v21 = vsel %vm695_vm12, %v1732_v17, %v1738_v20 }
 0xfea   : > { %v1745_v22 = vsel %vm3423_vm2, %v1743_v21, %v1727_v12 }
 0xfeb   : > { %1755 = vrot.lane.b32.xlu1 %v1745_v22, %s4156_s21  ;;  %1749 = vrot.lane.b32.xlu0 %v1745_v22, %s4157_s15 }
 0xfed   : > { %v1734_v23 = vpop.permute.xlu1 %1733 }
 0xff1   : > { %v1740_v24 = vpop.permute.xlu1 %1739 }
 0xff2   : > { %v1744_v26 = vsel %vm695_vm12, %v1734_v23, %v1740_v24 }
 0xff3   : > { %v1746_v27 = vsel %vm3460_vm5, %v1744_v26, %v1728_v16 }
 0xff4   : > { %1757 = vrot.lane.b32.xlu1 %v1746_v27, %s4156_s21  ;;  %1751 = vrot.lane.b32.xlu0 %v1746_v27, %s4157_s15 }
0x105d   : > { %v1756_v28 = vpop.permute.xlu1 %1755  ;;  %v1750_v29 = vpop.permute.xlu0 %1749 }
0x105e   : > { %v1761_v31 = vsel %vm714_vm13, %v1750_v29, %v1756_v28 }
0x105f   : > { %v1763_v32 = vsel %vm3451_vm4, %v1761_v31, %v1745_v22 }
0x1060   : > { %1773 = vrot.lane.b32.xlu1 %v1763_v32, %s4158_s0  ;;  %1767 = vrot.lane.b32.xlu0 %v1763_v32, %s3280_s19 }
0x1066   : > { %v1758_v38 = vpop.permute.xlu1 %1757  ;;  %v1752_v39 = vpop.permute.xlu0 %1751 }
0x1067   : > { %v1762_v40 = vsel %vm714_vm13, %v1752_v39, %v1758_v38 }
0x1068   : > { %v1764_v41 = vsel %vm3478_vm8, %v1762_v40, %v1746_v27 }
0x1069   : > { %1775 = vrot.lane.b32.xlu1 %v1764_v41, %s4158_s0  ;;  %1769 = vrot.lane.b32.xlu0 %v1764_v41, %s3280_s19 }
0x10d2   : > { %v1774_v44 = vpop.permute.xlu1 %1773  ;;  %v1768_v46 = vpop.permute.xlu0 %1767 }
0x10d3   : > { %v1779_v47 = vsel %vm733_vm14, %v1768_v46, %v1774_v44 }
0x10d4   : > { %v1781_v48 = vsel %vm3469_vm7, %v1779_v47, %v1763_v32 }
0x10d5   : > { %1791 = vrot.lane.b32.xlu1 %v1781_v48, %s4159_s9  ;;  %1785 = vrot.lane.b32.xlu0 %v1781_v48, %s4160_s16 }
0x10d9   : > { %1979 = vrot.lane.b32.xlu0 %v3404_v4, %s4160_s16  ;;  %1981 = vrot.lane.b32.xlu1 %v3415_v7, %s4160_s16 }
0x10db   : > { %v1776_v49 = vpop.permute.xlu1 %1775  ;;  %v1770_v50 = vpop.permute.xlu0 %1769 }
0x10dc   : > { %v1780_v51 = vsel %vm733_vm14, %v1770_v50, %v1776_v49 }
0x10dd   : > { %1884 = vrot.lane.b32.xlu0 %v3550_v45, %s4166_s7  ;;  %1882 = vrot.lane.b32.xlu1 %v3572_v58, %s4166_s7  ;;  %v1782_v45 = vsel %vm3488_vm11, %v1780_v51, %v1764_v41 }
0x10e1   : > { %2148 = vrot.lane.b32.xlu0 %v3432_v18, %s4160_s16  ;;  %2146 = vrot.lane.b32.xlu1 %v3434_v19, %s4160_s16  ;;  %v2808_v18 = vld [vmem:[%s4075_s3 + $0x70] sm:$0xff] }
0x1147   : > { %v1792_v4 = vpop.permute.xlu1 %1791  ;;  %v1786_v52 = vpop.permute.xlu0 %1785 }
0x1148   : > { %v1797_v7 = vsel %vm405_vm0, %v1786_v52, %v1792_v4 }
0x1149   : > { %3024 = vmatprep.mubr.msk.f32.mxu1 %vm756_vm15, %v1797_v7 }
0x114a   : > { %3025 = vmatmul.mubr.msk.f32.vlgmr.msra.gmra.mxu1 %vm756_vm15, %v1782_v45 }
0x114b   : > { %3035 = vmatpush3.xpose.msk.msra.mxu1 %vm405_vm0, %v2809_v43  ;;  %v1980_v19 = vpop.permute.xlu0 %1979  ;;  %v1982_v58 = vpop.permute.xlu1 %1981 }
0x114c   : > { %3036 = vmatprep.subr.msk.mxu1 %vm405_vm0, %v2808_v18  ;;  %3042 = vmatprep.mubr.msk.f32.mxu1 %vm405_vm0, %v1980_v19 }
0x114f   : > { %3037 = vmatpush3.xpose.msk.msra.mxu1 %vm405_vm0, %v2808_v18  ;;  %v1885_v55 = vpop.permute.xlu0 %1884  ;;  %v1883_v56 = vpop.permute.xlu1 %1882 }
0x1150   : > { %3027 = vmatprep.subr.mxu0 %v1885_v55  ;;  %3038 = vmatprep.subr.msk.mxu1 %vm405_vm0, %v2807_v53 }
0x1151   : > { %3028 = vmatpush3.msra.mxu0 %v1885_v55 }
0x1152   : > { %3029 = vmatprep.subr.mxu0 %v1883_v56 }
0x1153   : > { %3039 = vmatpush3.xpose.msk.msra.mxu1 %vm405_vm0, %v2807_v53  ;;  %3030 = vmatpush3.msra.mxu0 %v1883_v56  ;;  %v2149_v59 = vpop.permute.xlu0 %2148  ;;  %v2147_v60 = vpop.permute.xlu1 %2146 }
0x1154   : > { %3032 = vmatmul.mubr.msk.f32.vlgmr.msra.gmra.mxu0 %vm656_vm10, %v3791_v14  ;;  %3045 = vmatprep.subr.msk.mxu0 %vm405_vm0, %v2149_v59 }
0x1155   : > { %3040 = vmatprep.subr.msk.mxu1 %vm405_vm0, %v2806_v57  ;;  %3046 = vmatpush3.xpose.msk.msra.mxu0 %vm405_vm0, %v2149_v59 }
0x1156   : > { %3047 = vmatprep.subr.msk.mxu0 %vm405_vm0, %v2147_v60  ;;  %3049 = vmatprep.mubr.msk.f32.mxu0 %vm405_vm0, %v1980_v19 }
0x1157   : > { %3041 = vmatpush3.xpose.msk.msra.mxu1 %vm405_vm0, %v2806_v57 }
0x1159   : > { %3048 = vmatpush3.xpose.msk.msra.mxu0 %vm405_vm0, %v2147_v60 }
0x115a   : > { %3043 = vmatmul.mubr.msk.f32.vlgmr.msra.gmra.mxu1 %vm405_vm0, %v1982_v58  ;;  %3052 = vmatprep.subr.mxu0 %v2813_v30 }
0x115c   : > { %3050 = vmatmul.mubr.msk.f32.vlgmr.msra.gmra.mxu0 %vm405_vm0, %v1982_v58 }
0x115d   : > { %3053 = vmatpush3.msra.mxu0 %v2813_v30 }
0x120a   : > { %v3026_v61 = vpop.f32.mrf.mxu1 }
0x120c   : > { %v1873_v0 = vpop.f32.mrf.mxu1 }
0x1214   : > { %v3033_v62 = vpop.f32.mrf.mxu0 }
0x1215   : > { %v3882_v63 = vadd.f32 %v3033_v62, %v3026_v61 }
0x1216   : > { %v1960_v1 = vpop.f32.mrf.mxu0 }
0x1217   : > { %v3884_v2 = vadd.f32 %v1960_v1, %v1873_v0 }
0x121a   : > { %v3044_v5 = vpop.f32.mrf.mxu1 }
0x121c   : > { %v2065_v6 = vpop.f32.mrf.mxu1  ;;  %v3051_v37 = vpop.f32.mrf.mxu0 }
0x121d   : > { %2082 = vrot.lane.b32.xlu1 %v2065_v6, %s4162_s10  ;;  %2076 = vrot.lane.b32.xlu0 %v2065_v6, %s4163_s2 }
0x121e   : > { %v2220_v40 = vpop.f32.mrf.mxu0 }
0x128f   : > { %v2083_v11 = vpop.permute.xlu1 %2082  ;;  %v2077_v12 = vpop.permute.xlu0 %2076 }
0x1290   : > { %v2088_v13 = vsel %vm513_vm1, %v2077_v12, %v2083_v11 }
0x1291   : > { %v2090_v14 = vsel %vm3423_vm2, %v2088_v13, %v2065_v6 }
0x1292   : > { %2100 = vrot.lane.b32.xlu1 %v2090_v14, %s4164_s17  ;;  %2094 = vrot.lane.b32.xlu0 %v2090_v14, %s4165_s1 }
0x1296   : > { %2084 = vrot.lane.b32.xlu1 %v3044_v5, %s4162_s10  ;;  %2078 = vrot.lane.b32.xlu0 %v3044_v5, %s4163_s2 }
0x1304   : > { %v2101_v16 = vpop.permute.xlu1 %2100  ;;  %v2095_v17 = vpop.permute.xlu0 %2094 }
0x1305   : > { %v2106_v20 = vsel %vm532_vm3, %v2095_v17, %v2101_v16 }
0x1306   : > { %v2108_v21 = vsel %vm3451_vm4, %v2106_v20, %v2090_v14 }
0x1307   : > { %2118 = vrot.lane.b32.xlu1 %v2108_v21, %s4151_s22  ;;  %2112 = vrot.lane.b32.xlu0 %v2108_v21, %s4152_s30 }
0x1308   : > { %v2085_v22 = vpop.permute.xlu1 %2084  ;;  %v2079_v23 = vpop.permute.xlu0 %2078 }
0x1309   : > { %v2089_v24 = vsel %vm513_vm1, %v2079_v23, %v2085_v22 }
0x130a   : > { %v2091_v26 = vsel %vm3460_vm5, %v2089_v24, %v3044_v5  ;;  %v2812_v24 = vld [vmem:[%s4076_s4 + $0x70] sm:$0xff] }
0x130b   : > { %2102 = vrot.lane.b32.xlu1 %v2091_v26, %s4164_s17  ;;  %2096 = vrot.lane.b32.xlu0 %v2091_v26, %s4165_s1 }
0x130c   : > { %3054 = vmatprep.subr.mxu0 %v2812_v24 }
0x130d   : > { %3055 = vmatpush3.msra.mxu0 %v2812_v24 }
0x1379   : > { %v2119_v27 = vpop.permute.xlu1 %2118  ;;  %v2113_v28 = vpop.permute.xlu0 %2112 }
0x137a   : > { %v2124_v29 = vsel %vm551_vm6, %v2113_v28, %v2119_v27 }
0x137b   : > { %v2126_v31 = vsel %vm3469_vm7, %v2124_v29, %v2108_v21 }
0x137c   : > { %2136 = vrot.lane.b32.xlu1 %v2126_v31, %s4153_s8  ;;  %2130 = vrot.lane.b32.xlu0 %v2126_v31, %s4161_s18  ;;  %s3285_s18 = smov [#allocation2]  }
0x137d   : > { %v2103_v32 = vpop.permute.xlu1 %2102  ;;  %v2097_v33 = vpop.permute.xlu0 %2096  ;;  %s3193_s10 = sshll.u32 %s3285_s18, 4  ;;  %s3194_s10 = int_to_ptr.vmem [resolvable:$false] %s3193_s10 }
0x137e   : > { %v2107_v34 = vsel %vm532_vm3, %v2097_v33, %v2103_v32  ;;  %v2810_v32 = vld [vmem:[%s4076_s4 + $0x60] sm:$0xff] }
0x137f   : > { %v2109_v35 = vsel %vm3478_vm8, %v2107_v34, %v2091_v26  ;;  %v2811_v26 = vld [vmem:[%s4076_s4 + $0x68] sm:$0xff] }
0x1380   : > { %2120 = vrot.lane.b32.xlu1 %v2109_v35, %s4151_s22  ;;  %2114 = vrot.lane.b32.xlu0 %v2109_v35, %s4152_s30 }
0x1381   : > { %3056 = vmatprep.subr.mxu0 %v2811_v26 }
0x1382   : > { %3057 = vmatpush3.msra.mxu0 %v2811_v26 }
0x1383   : > { %3058 = vmatprep.subr.mxu0 %v2810_v32 }
0x1384   : > { %3059 = vmatpush3.msra.mxu0 %v2810_v32 }
0x13ee   : > { %v2137_v38 = vpop.permute.xlu1 %2136  ;;  %v2131_v39 = vpop.permute.xlu0 %2130 }
0x13ef   : > { %v2142_v41 = vsel %vm570_vm9, %v2131_v39, %v2137_v38  ;;  %v3188_v38 = vld [vmem:[%s3547_s23] sm:$0xff] }
0x13f0   : > { %v2221_v43 = vadd.f32 %v2220_v40, %v2142_v41 }
0x13f2   : > { %v2121_v44 = vpop.permute.xlu1 %2120  ;;  %v2115_v46 = vpop.permute.xlu0 %2114  ;;  %v2229_v47 = vsel %vm656_vm10, %v2221_v43, -inf }
0x13f3   : > { %v2125_v48 = vsel %vm551_vm6, %v2115_v46, %v2121_v44  ;;  %2230 = vmax.xlane.f32.xlu0 %v2229_v47  ;;  %v2523_v46 = vld [vmem:[%s4077_s5] sm:$0xff] }
0x13f4   : > { %v2127_v49 = vsel %vm3488_vm11, %v2125_v48, %v2109_v35 }
0x13f5   : > { %v2226_v50 = vadd.f32 %v3051_v37, %v2127_v49 }
0x13f7   : > { %v2232_v51 = vsel %vm656_vm10, %v2226_v50, -inf }
0x13f8   : > { %2233 = vmax.xlane.f32.xlu1 %v2232_v51 }
0x147c   : > { %v2231_v4 = vpop.xlane.xlu0 %2230 }
0x147d   : > { %v2235_v52 = vsub.f32 %v2221_v43, %v2231_v4 }
0x147f   : > { %v2237_v7 = vmul.f32 1.442695, %v2235_v52 }
0x1481   : > { %3179 = vpow2.f32 %v2237_v7  ;;  %v2234_v45 = vpop.xlane.xlu1 %2233 }
0x1482   : > { %v2236_v18 = vsub.f32 %v2226_v50, %v2234_v45 }
0x1484   : > { %v2239_v19 = vmul.f32 1.442695, %v2236_v18 }
0x1486   : > { %3181 = vpow2.f32 %v2239_v19 }
0x148e   : > { %v3180_v58 = vpop.eup %3179 }
0x148f   : > { %v2241_v53 = vsel %vm656_vm10, %v3180_v58, 0.0 }
0x1490   : > { %2242 = vadd.xlane.f32.xlu0 %v2241_v53 }
0x1493   : > { %v3182_v55 = vpop.eup %3181 }
0x1494   : > { %v2244_v56 = vsel %vm656_vm10, %v3182_v55, 0.0 }
0x1495   : > { %2245 = vadd.xlane.f32.xlu0 %v2244_v56 }
0x1519   : > { %v2243_v57 = vpop.xlane.xlu0 %2242 }
0x151a   : > { %3183 = vrcp.f32 %v2243_v57 }
0x151e   : > { %v2246_v59 = vpop.xlane.xlu0 %2245 }
0x151f   : > { %3185 = vrcp.f32 %v2246_v59 }
0x1527   : > { %v3184_v60 = vpop.eup %3183 }
0x1528   : > { %v2249_v61 = vmul.f32 %v3184_v60, %v3180_v58 }
0x152a   : > { %3067 = vmatprep.mubr.msk.f32.mxu1 %vm656_vm10, %v2249_v61  ;;  %v2251_v62 = vsel %vm656_vm10, %v2249_v61, 0.0 }
0x152b   : > { %2261 = vrot.lane.b32.xlu0 %v2251_v62, %s4154_s12  ;;  %2255 = vrot.lane.b32.xlu1 %v2251_v62, %s4155_s20 }
0x152c   : > { %v3186_v0 = vpop.eup %3185 }
0x152d   : > { %v3927_v1 = vmul.f32 %v3186_v0, %v3182_v55 }
0x152f   : > { %v2252_v5 = vsel %vm656_vm10, %v3927_v1, 0.0 }
0x1530   : > { %2257 = vrot.lane.b32.xlu1 %v2252_v5, %s4155_s20  ;;  %s2839_s20 = sshll.u32 %s3257_s27, 8 }
0x1534   : > { %2263 = vrot.lane.b32.xlu1 %v2252_v5, %s4154_s12  ;;  %s4168_s12 = sld [smem:[#allocation16_spill]] }
0x159d   : > { %v2256_v6 = vpop.permute.xlu1 %2255  ;;  %v2262_v11 = vpop.permute.xlu0 %2261 }
0x159e   : > { %v2267_v12 = vsel %vm695_vm12, %v2256_v6, %v2262_v11 }
0x159f   : > { %v2269_v13 = vsel %vm3423_vm2, %v2267_v12, %v2251_v62 }
0x15a0   : > { %2279 = vrot.lane.b32.xlu1 %v2269_v13, %s4156_s21  ;;  %2273 = vrot.lane.b32.xlu0 %v2269_v13, %s4157_s15 }
0x15a2   : > { %v2258_v14 = vpop.permute.xlu1 %2257 }
0x15a6   : > { %v2264_v16 = vpop.permute.xlu1 %2263 }
0x15a7   : > { %v2268_v17 = vsel %vm695_vm12, %v2258_v14, %v2264_v16 }
0x15a8   : > { %v2270_v20 = vsel %vm3460_vm5, %v2268_v17, %v2252_v5 }
0x15a9   : > { %2281 = vrot.lane.b32.xlu1 %v2270_v20, %s4156_s21  ;;  %2275 = vrot.lane.b32.xlu0 %v2270_v20, %s4157_s15  ;;  %s4023_s15 = scalar_lea.hbm %s4168_s12, %s2839_s20 }
0x1612   : > { %v2280_v21 = vpop.permute.xlu1 %2279  ;;  %v2274_v22 = vpop.permute.xlu0 %2273 }
0x1613   : > { %v2285_v15 = vsel %vm714_vm13, %v2274_v22, %v2280_v21 }
0x1614   : > { %v2287_v23 = vsel %vm3451_vm4, %v2285_v15, %v2269_v13 }
0x1615   : > { %2297 = vrot.lane.b32.xlu1 %v2287_v23, %s4158_s0  ;;  %2291 = vrot.lane.b32.xlu0 %v2287_v23, %s3280_s19 }
0x1619   : > { %2408 = vrot.lane.b32.xlu0 %v3187_v25, %s4160_s16 }
0x161b   : > { %v2282_v27 = vpop.permute.xlu1 %2281  ;;  %v2276_v28 = vpop.permute.xlu0 %2275 }
0x161c   : > { %v2286_v29 = vsel %vm714_vm13, %v2276_v28, %v2282_v27 }
0x161d   : > { %v2288_v31 = vsel %vm3478_vm8, %v2286_v29, %v2270_v20 }
0x161e   : > { %2299 = vrot.lane.b32.xlu0 %v2288_v31, %s4158_s0  ;;  %2293 = vrot.lane.b32.xlu1 %v2288_v31, %s3280_s19  ;;  %s3284_s19 = smov 16  }
0x1687   : > { %v2298_v33 = vpop.permute.xlu1 %2297  ;;  %v2292_v34 = vpop.permute.xlu0 %2291 }
0x1688   : > { %v2303_v35 = vsel %vm733_vm14, %v2292_v34, %v2298_v33 }
0x1689   : > { %v2305_v37 = vsel %vm3469_vm7, %v2303_v35, %v2287_v23 }
0x168a   : > { %2315 = vrot.lane.b32.xlu0 %v2305_v37, %s4159_s9  ;;  %2309 = vrot.lane.b32.xlu1 %v2305_v37, %s4160_s16 }
0x168b   : > { %v2409_v42 = vpop.permute.xlu0 %2408 }
0x168c   : > { %3063 = vmatprep.subr.mxu1 %v2409_v42 }
0x168d   : > { %3064 = vmatpush3.msra.mxu1 %v2409_v42 }
0x168e   : > { %2495 = vrot.lane.b32.xlu0 %v3748_v9, %s4159_s9  ;;  %2406 = vrot.lane.b32.xlu1 %v3188_v38, %s4160_s16 }
0x1690   : > { %v2294_v36 = vpop.permute.xlu1 %2293  ;;  %v2300_v39 = vpop.permute.xlu0 %2299 }
0x1691   : > { %v2304_v40 = vsel %vm733_vm14, %v2294_v36, %v2300_v39 }
0x1692   : > { %2503 = vrot.lane.b32.xlu0 %v3884_v2, %s3284_s19  ;;  %2497 = vrot.lane.b32.xlu1 %v3746_v3, %s4159_s9  ;;  %v2306_v9 = vsel %vm3488_vm11, %v2304_v40, %v2288_v31  ;;  %v2526_v3 = vld [vmem:[%s4077_s5 + $0x18] sm:$0xff] }
0x1693   : > { %3070 = vmatprep.subr.mxu0 %v2526_v3 }
0x1696   : > { %2505 = vrot.lane.b32.xlu1 %v3882_v63, %s3284_s19  ;;  %v2525_v63 = vld [vmem:[%s4077_s5 + $0x10] sm:$0xff]  ;;  %s3195_s19 = scalar_lea.vmem %s3194_s10, 512 }
0x16fc   : > { %v2310_v41 = vpop.permute.xlu1 %2309  ;;  %v2316_v43 = vpop.permute.xlu0 %2315 }
0x16fd   : > { %v2321_v44 = vsel %vm405_vm0, %v2310_v41, %v2316_v43 }
0x16fe   : > { %3060 = vmatprep.mubr.msk.f32.mxu0 %vm756_vm15, %v2321_v44 }
0x16ff   : > { %3061 = vmatmul.mubr.msk.f32.vlgmr.msra.gmra.mxu0 %vm756_vm15, %v2306_v9 }
0x1700   : > { %v2407_v2 = vpop.permute.xlu1 %2406  ;;  %3071 = vmatpush3.msra.mxu0 %v2526_v3  ;;  %v2496_v7 = vpop.permute.xlu0 %2495 }
0x1701   : > { %3065 = vmatprep.subr.mxu1 %v2407_v2  ;;  %3072 = vmatprep.subr.mxu0 %v2525_v63  ;;  %v2517_v19 = vsel %vm405_vm0, %v3612_v10, %v2496_v7 }
0x1702   : > { %3066 = vmatpush3.msra.mxu1 %v2407_v2  ;;  %3073 = vmatpush3.msra.mxu0 %v2525_v63 }
0x1703   : > { %3068 = vmatmul.mubr.msk.f32.vlgmr.msra.gmra.mxu1 %vm656_vm10, %v3927_v1  ;;  %3074 = vmatprep.subr.mxu0 %v2524_v54 }
0x1704   : > { %3075 = vmatpush3.msra.mxu0 %v2524_v54  ;;  %v2498_v52 = vpop.permute.xlu1 %2497  ;;  %v2504_v18 = vpop.permute.xlu0 %2503 }
0x1705   : > { %3076 = vmatprep.subr.mxu0 %v2523_v46  ;;  %v2518_v53 = vsel %vm405_vm0, %v3610_v8, %v2498_v52  ;;  %v2519_v55 = vsel %vm656_vm10, %v2517_v19, %v2504_v18  ;;  %v2828_v8 = vld [vmem:[%s4078_s6] ss:$0 sm:$0xff] }
0x1706   : > { %3077 = vmatpush3.msra.mxu0 %v2523_v46 }
0x1708   : > { %v2506_v45 = vpop.permute.xlu1 %2505 }
0x1709   : > { %v2520_v57 = vsel %vm656_vm10, %v2518_v53, %v2506_v45 }
0x17bf   : > { %v3062_v47 = vpop.f32.mrf.mxu0 }
0x17c1   : > { %v2397_v50 = vpop.f32.mrf.mxu0 }
0x17c3   : > { %v3069_v48 = vpop.f32.mrf.mxu1 }
0x17c4   : > { %v2490_v49 = vadd.f32 %v3069_v48, %v3062_v47 }
0x17c5   : > { %v2484_v51 = vpop.f32.mrf.mxu1 }
0x17c6   : > { %v2485_v4 = vadd.f32 %v2484_v51, %v2397_v50  ;;  %2513 = vrot.lane.b32.xlu1 %v2490_v49, %s4153_s8 }
0x17c8   : > { %2511 = vrot.lane.b32.xlu0 %v2485_v4, %s4153_s8  ;;  %s324_s8 = sand.u32 1, %s3249_s25  }
0x17c9   : > { %s2741_s28 = sshll.u32 %s324_s8, 4  ;;  %s4026_s21 = scalar_lea.sflag [#allocation3], %s324_s8 }
0x17ca   : > { %s326_s14 = scalar_lea.vmem [#allocation2], %s2741_s28 }
0x17cb   : > { %s2633_s24 = sshll.u32 %s326_s14, 4  ;;  %s4017_s24 = int_to_ptr.vmem [resolvable:$true] %s2633_s24 }
0x17cc   : > { %s3189_s27 = scalar_lea.vmem %s4017_s24, 256  ;;  %p3196_p1 = scmp.lt.s32.totalorder %s4017_s24, %s3194_s10 }
0x17cd   : > { %p3190_p12 = scmp.ne.s32.totalorder %s4017_s24, %s3189_s27  ;;  %p3197_p2 = scmp.lt.s32.totalorder %s3195_s19, %s3189_s27 }
0x17cf   : > { %p3191_p13 = pnand %p3190_p12, %p3367_p4  ;;  %p3198_p3 = por %p3197_p2, %p3196_p1 }
0x17d1   : > { %p3192_p0 = pneg %p3191_p13 }
0x17d3   : > { %p3199_p5 = pnand %p3198_p3, %p3192_p0 }
0x1838   : > { %v2514_v58 = vpop.permute.xlu1 %2513 }
0x1839   : > { %v2522_v60 = vsel %vm570_vm9, %v2520_v57, %v2514_v58 }
0x183a   : > { %v2512_v56 = vpop.permute.xlu0 %2511 }
0x183b   : > { %v2521_v59 = vsel %vm570_vm9, %v2519_v55, %v2512_v56 }
0x183c   : > { %3078 = vmatprep.mubr.msk.f32.mxu0 %vm756_vm15, %v2521_v59 }
0x183d   : > { %3079 = vmatmul.mubr.msk.f32.vlgmr.msra.gmra.mxu0 %vm756_vm15, %v2522_v60 }
0x18fd   : > { %v3080_v10 = vpop.f32.mrf.mxu0 }
0x18fe   : > { %v2612_v61 = vadd.f32 %v3080_v10, %v2828_v8 }
0x18ff   : > { %v2606_v62 = vpop.f32.mrf.mxu0 }
0x1900   : > { %2616 = vst.msk [vmem:[%s326_s14 + $0x8] sm:$0xff] %vm756_vm15, %v2612_v61  ;;  %v2607_v0 = vadd.f32 %v2828_v8, %v2606_v62 }
0x1902   : > { %2615 = vst.msk [vmem:[%s326_s14] sm:$0xff] %vm756_vm15, %v2607_v0 }
0x1903   : > { %3202 = shalt.err (!%p3199_p5)
}
0x1904   : > { %s3203_s23 = scalar_lea.hbm %s4023_s15, 256  ;;  %s3207_s2 = scalar_lea.hbm %s4168_s12, 512 }
0x1905   : > { %p3204_p6 = scmp.ne.s32.totalorder %s4023_s15, %s3203_s23  ;;  %p3208_p10 = scmp.lt.s32.totalorder %s4023_s15, %s4168_s12 }
0x1906   : > { %p3209_p11 = scmp.lt.s32.totalorder %s3207_s2, %s3203_s23 }
0x1907   : > { %p3205_p7 = pnand %p3204_p6, %p3367_p4 }
0x1908   : > { %p3210_p12 = por %p3209_p11, %p3208_p10 }
0x1909   : > { %p3206_p9 = pneg %p3205_p7 }
0x190b   : > { %p3211_p13 = pnand %p3210_p12, %p3206_p9 }
0x190d   : > { %3214 = shalt.err (!%p3211_p13)
}
0x190e   : > { %s3286_s26 = smov 128  }
0x190f   : > { %3081 = dma.vmem_to_hbm [thread:$0]  (%p3367_p4), %s4017_s24, 256, %s4023_s15, %s4026_s21, %s3286_s26, %s3286_s26, %s4159_s9  }
0x1910 PF: > { %s4169_s7 = sld [smem:[#allocation8_spill]] }
0x1911   : > { %s4170_s8 = sld [smem:[#allocation5_spill]] }
0x1916   : > { %p3087_p0 = scmp.ge.s32.totalorder %s4169_s7, 2 }
0x1917   : > { %s2648_s29 = sand.u32 1, %s4170_s8  }
0x1918   : > { %p3084_p1 = pnand %p3087_p0, %p3374_p8  ;;  %s2649_s11 = scalar_lea.sflag [#allocation3], %s2648_s29 }
0x191a   : > { %p3085_p2 = pneg %p3084_p1 }
0x191c   : > { %3240 = dma.done.wait (%p3085_p2), %s2649_s11, 256  }
0x191d   : > { %3242 = vsyncadd (%p3085_p2), %s2649_s11, 4294967040  ;;  %s20_s29 = sadd.s32 1, %s4169_s7   ;;  %s4172_s13 = sld [smem:[#allocation6_spill]] }
0x191e   : > { %p17_p3 = scmp.ge.s32.totalorder %s20_s29, 4   ;;  %s4173_s26 = sld [smem:[#allocation12_spill]] }
0x191f   : > { %s4174_s27 = sld [smem:[#allocation7_spill]]  ;;  %s4176_s24 = smov %s3249_s25 }
0x1920   : > { %s4175_s28 = sld [smem:[#allocation9_spill]]  ;;  %19 = sbr.rel (!%p17_p3) target bundleno = 9 (0x9), region = 95 }
0x1923   : > { %s4177_s25 = smov %s4172_s13 }
0x1925   :  { %2654 = vsyncpa [#allocation3], 1 }
0x1926   :  { %2656 = vsyncpa [#allocation3 + $0x1], 1 }

</bundles_post_ra>
